<compile_context>
chip_gen: v7x
topology: tpu7x:2x2x1
jax: 0.10.0
libtpu: 0.0.40
codegen_flags: <defaults>
</compile_context>

<pallas_src>
import functools

import jax
import jax.numpy as jnp
from jax.experimental import pallas as pl
from jax.experimental.pallas import tpu as pltpu


def _leaky_relu(x, slope=0.2):
    return jnp.where(x > 0, x, slope * x)


def _linear(x, w_ref, b_ref):
    # bf16 operands on the MXU, f32 accumulation; bias add in f32.
    return (
        jnp.dot(x.astype(jnp.bfloat16), w_ref[...],
                preferred_element_type=jnp.float32)
        + b_ref[...]
    )


def vae_kernel(
    x_ref,
    # encoder
    ew1, eb1, ew2, eb2, ew3, eb3,
    # fused latent heads [mu | sigma]
    whead, bhead,
    # decoder
    dw1, db1, dw2, db2, dw3, db3, dw4, db4,
    # reparameterization noise (uniform [0,1), as torch.rand_like)
    eps_ref,
    # outputs
    recon_ref, mulogvar_ref,
):
    n_latent = eps_ref.shape[-1]
    x = x_ref[...]  # f32 input tile (cast to bf16 happens inside _linear)

    # ---- Encoder: 3 x (Linear -> LeakyReLU(0.2)) ----
    h = _leaky_relu(_linear(x, ew1, eb1))
    h = _leaky_relu(_linear(h, ew2, eb2))
    h = _leaky_relu(_linear(h, ew3, eb3))

    # ---- Fused latent heads: one matmul producing [mu | logvar] ----
    ml = _linear(h, whead, bhead)          # (tile_b, 2*n_latent), f32
    mu = ml[:, :n_latent]
    logvar = ml[:, n_latent:]

    # ---- Reparameterize: eps * exp(0.5*logvar) + mu ----
    z = eps_ref[...] * jnp.exp(0.5 * logvar) + mu

    # ---- Decoder: 3 x (Linear -> LeakyReLU(0.2)) + final Linear ----
    d = _leaky_relu(_linear(z, dw1, db1))
    d = _leaky_relu(_linear(d, dw2, db2))
    d = _leaky_relu(_linear(d, dw3, db3))
    recon = _linear(d, dw4, db4)

    recon_ref[...] = recon.astype(recon_ref.dtype)
    mulogvar_ref[...] = ml.astype(mulogvar_ref.dtype)


def init_linear_params(key, in_f, out_f):
    """PyTorch-style init: U(-1/sqrt(in), 1/sqrt(in)). Weight pre-transposed (in, out)."""
    kw, kb = jax.random.split(key)
    bound = 1.0 / jnp.sqrt(jnp.float32(in_f))
    w = jax.random.uniform(kw, (in_f, out_f), jnp.float32, -bound, bound)
    b = jax.random.uniform(kb, (1, out_f), jnp.float32, -bound, bound)
    return w, b


def make_vae_params(key, n_features, out_features, n_latent):
    enc_h1 = n_features // 2
    enc_h2 = enc_h1 // 2
    enc_h3 = enc_h2 // 2
    dec_h3 = out_features // 2
    dec_h2 = dec_h3 // 2
    dec_h1 = dec_h2 // 2
    # nn.Linear(int(n_features / 8), n_latent): equals enc_h3 only when
    # n_features % 8 == 0 (the reference module implicitly assumes this).
    head_in = n_features // 8

    keys = jax.random.split(key, 9)
    ew1, eb1 = init_linear_params(keys[0], n_features, enc_h1)
    ew2, eb2 = init_linear_params(keys[1], enc_h1, enc_h2)
    ew3, eb3 = init_linear_params(keys[2], enc_h2, enc_h3)
    wmu, bmu = init_linear_params(keys[3], head_in, n_latent)
    wsig, bsig = init_linear_params(keys[4], head_in, n_latent)
    dw1, db1 = init_linear_params(keys[5], n_latent, dec_h1)
    dw2, db2 = init_linear_params(keys[6], dec_h1, dec_h2)
    dw3, db3 = init_linear_params(keys[7], dec_h2, dec_h3)
    dw4, db4 = init_linear_params(keys[8], dec_h3, out_features)

    # Fuse mu / sigma heads into one (head_in, 2*n_latent) Linear.
    whead = jnp.concatenate([wmu, wsig], axis=1)
    bhead = jnp.concatenate([bmu, bsig], axis=1)

    weights = [ew1, ew2, ew3, whead, dw1, dw2, dw3, dw4]
    biases = [eb1, eb2, eb3, bhead, db1, db2, db3, db4]

    # Weights cast to bf16 once here (MXU operands, half the VMEM/HBM traffic);
    # biases stay f32 (added to the f32 accumulator).
    params = []
    for w, b in zip(weights, biases):
        params.append(w.astype(jnp.bfloat16))
        params.append(b)
    return params  # flat list [w1, b1, ..., w8, b8], length 16


@functools.partial(jax.jit, static_argnames=("tile_b",))
def vae_forward(x, params, eps, *, tile_b=128):
    batch, n_features = x.shape
    n_latent = eps.shape[1]
    out_features = params[-2].shape[1]  # dw4 is (dec_h3, out_features)

    tile_b = min(tile_b, batch)
    grid = (pl.cdiv(batch, tile_b),)

    def resident(p):
        # Same block every grid step -> weight/bias stays in VMEM, no re-DMA.
        return pl.BlockSpec(p.shape, lambda i: (0, 0))

    in_specs = (
        [pl.BlockSpec((tile_b, n_features), lambda i: (i, 0))]
        + [resident(p) for p in params]
        + [pl.BlockSpec((tile_b, n_latent), lambda i: (i, 0))]
    )
    out_specs = (
        pl.BlockSpec((tile_b, out_features), lambda i: (i, 0)),
        pl.BlockSpec((tile_b, 2 * n_latent), lambda i: (i, 0)),
    )

    recon, mulogvar = pl.pallas_call(
        vae_kernel,
        out_shape=(
            jax.ShapeDtypeStruct((batch, out_features), jnp.float32),
            jax.ShapeDtypeStruct((batch, 2 * n_latent), jnp.float32),
        ),
        grid=grid,
        in_specs=in_specs,
        out_specs=out_specs,
        compiler_params=pltpu.CompilerParams(
            dimension_semantics=("parallel",),       # lets v7x use both TCs
            vmem_limit_bytes=48 * 1024 * 1024,       # < v7x 64 MiB physical
        ),
    )(x, *params, eps)

    mu = mulogvar[:, :n_latent]
    logvar = mulogvar[:, n_latent:]
    return recon, mu, logvar


if __name__ == "__main__":
    # Shapes consistent with the module: n_features divisible by 8.
    # batch is a multiple of tile_b=128 so each grid step fills MXU rows.
    batch = 256
    n_features = 256
    out_features = 256
    n_latent = 16

    key = jax.random.PRNGKey(0)
    kx, kp, keps = jax.random.split(key, 3)

    x = jax.random.normal(kx, (batch, n_features), jnp.float32)
    params = make_vae_params(kp, n_features, out_features, n_latent)
    # torch.rand_like -> uniform [0, 1) (matches the reference reparameterize)
    eps = jax.random.uniform(keps, (batch, n_latent), jnp.float32)

    recon, mu, logvar = vae_forward(x, params, eps)
    jax.block_until_ready((recon, mu, logvar))

    assert recon.shape == (batch, out_features)
    assert mu.shape == (batch, n_latent)
    assert logvar.shape == (batch, n_latent)
    assert bool(
        jnp.isfinite(recon).all() & jnp.isfinite(mu).all() & jnp.isfinite(logvar).all()
    )
    print("KERNEL_OK")
</pallas_src>

<mosaic_0001>
module attributes {stable_mosaic.version = 11 : i64} {
  func.func @vae_kernel(%arg0: i32, %arg1: memref<128x256xf32, #tpu.memory_space<vmem>>, %arg2: memref<256x128xbf16, #tpu.memory_space<vmem>>, %arg3: memref<1x128xf32, #tpu.memory_space<vmem>>, %arg4: memref<128x64xbf16, #tpu.memory_space<vmem>>, %arg5: memref<1x64xf32, #tpu.memory_space<vmem>>, %arg6: memref<64x32xbf16, #tpu.memory_space<vmem>>, %arg7: memref<1x32xf32, #tpu.memory_space<vmem>>, %arg8: memref<32x32xbf16, #tpu.memory_space<vmem>>, %arg9: memref<1x32xf32, #tpu.memory_space<vmem>>, %arg10: memref<16x32xbf16, #tpu.memory_space<vmem>>, %arg11: memref<1x32xf32, #tpu.memory_space<vmem>>, %arg12: memref<32x64xbf16, #tpu.memory_space<vmem>>, %arg13: memref<1x64xf32, #tpu.memory_space<vmem>>, %arg14: memref<64x128xbf16, #tpu.memory_space<vmem>>, %arg15: memref<1x128xf32, #tpu.memory_space<vmem>>, %arg16: memref<128x256xbf16, #tpu.memory_space<vmem>>, %arg17: memref<1x256xf32, #tpu.memory_space<vmem>>, %arg18: memref<128x16xf32, #tpu.memory_space<vmem>>, %arg19: memref<128x256xf32, #tpu.memory_space<vmem>>, %arg20: memref<128x32xf32, #tpu.memory_space<vmem>>) attributes {dimension_semantics = [#tpu.dimension_semantics<parallel>], iteration_bounds = array<i64: 2>, scalar_prefetch = 0 : i64, scratch_operands = 0 : i64, tpu.core_type = #tpu.core_type<tc>, window_params = [{transform_indices = @transform_0, window_bounds = array<i64: 128, 256>}, {pipeline_mode = #tpu.pipeline_mode<synchronous>, transform_indices = @transform_1, window_bounds = array<i64: 256, 128>}, {pipeline_mode = #tpu.pipeline_mode<synchronous>, transform_indices = @transform_2, window_bounds = array<i64: 1, 128>}, {pipeline_mode = #tpu.pipeline_mode<synchronous>, transform_indices = @transform_3, window_bounds = array<i64: 128, 64>}, {pipeline_mode = #tpu.pipeline_mode<synchronous>, transform_indices = @transform_4, window_bounds = array<i64: 1, 64>}, {pipeline_mode = #tpu.pipeline_mode<synchronous>, transform_indices = @transform_5, window_bounds = array<i64: 64, 32>}, {pipeline_mode = #tpu.pipeline_mode<synchronous>, transform_indices = @transform_6, window_bounds = array<i64: 1, 32>}, {pipeline_mode = #tpu.pipeline_mode<synchronous>, transform_indices = @transform_7, window_bounds = array<i64: 32, 32>}, {pipeline_mode = #tpu.pipeline_mode<synchronous>, transform_indices = @transform_8, window_bounds = array<i64: 1, 32>}, {pipeline_mode = #tpu.pipeline_mode<synchronous>, transform_indices = @transform_9, window_bounds = array<i64: 16, 32>}, {pipeline_mode = #tpu.pipeline_mode<synchronous>, transform_indices = @transform_10, window_bounds = array<i64: 1, 32>}, {pipeline_mode = #tpu.pipeline_mode<synchronous>, transform_indices = @transform_11, window_bounds = array<i64: 32, 64>}, {pipeline_mode = #tpu.pipeline_mode<synchronous>, transform_indices = @transform_12, window_bounds = array<i64: 1, 64>}, {pipeline_mode = #tpu.pipeline_mode<synchronous>, transform_indices = @transform_13, window_bounds = array<i64: 64, 128>}, {pipeline_mode = #tpu.pipeline_mode<synchronous>, transform_indices = @transform_14, window_bounds = array<i64: 1, 128>}, {pipeline_mode = #tpu.pipeline_mode<synchronous>, transform_indices = @transform_15, window_bounds = array<i64: 128, 256>}, {pipeline_mode = #tpu.pipeline_mode<synchronous>, transform_indices = @transform_16, window_bounds = array<i64: 1, 256>}, {transform_indices = @transform_17, window_bounds = array<i64: 128, 16>}, {transform_indices = @transform_18, window_bounds = array<i64: 128, 256>}, {transform_indices = @transform_19, window_bounds = array<i64: 128, 32>}]} {
    %c0 = arith.constant 0 : index
    %c0_0 = arith.constant 0 : index
    %0 = vector.load %arg1[%c0, %c0_0] : memref<128x256xf32, #tpu.memory_space<vmem>>, vector<128x256xf32>
    %1 = arith.truncf %0 : vector<128x256xf32> to vector<128x256xbf16>
    %c0_1 = arith.constant 0 : index
    %c0_2 = arith.constant 0 : index
    %2 = vector.load %arg2[%c0_1, %c0_2] : memref<256x128xbf16, #tpu.memory_space<vmem>>, vector<256x128xbf16>
    %cst = arith.constant dense<0.000000e+00> : vector<128x128xf32>
    %3 = tpu.matmul %1, %2, %cst {dimension_numbers = #tpu.dot_dimension_numbers<[1], [0], [0], [1], [0, 0, 1, 1], [], []>} : vector<128x256xbf16>, vector<256x128xbf16>, vector<128x128xf32> -> vector<128x128xf32>
    %c0_3 = arith.constant 0 : index
    %c0_4 = arith.constant 0 : index
    %4 = vector.load %arg3[%c0_3, %c0_4] : memref<1x128xf32, #tpu.memory_space<vmem>>, vector<1x128xf32>
    %5 = vector.broadcast %4 : vector<1x128xf32> to vector<128x128xf32>
    %6 = arith.addf %3, %5 : vector<128x128xf32>
    %cst_5 = arith.constant 0.000000e+00 : f32
    %7 = vector.broadcast %cst_5 : f32 to vector<128x128xf32>
    %8 = arith.cmpf ogt, %6, %7 : vector<128x128xf32>
    %cst_6 = arith.constant 2.000000e-01 : f32
    %9 = vector.broadcast %cst_6 : f32 to vector<128x128xf32>
    %10 = arith.mulf %9, %6 : vector<128x128xf32>
    %11 = arith.select %8, %6, %10 : vector<128x128xi1>, vector<128x128xf32>
    %12 = arith.truncf %11 : vector<128x128xf32> to vector<128x128xbf16>
    %c0_7 = arith.constant 0 : index
    %c0_8 = arith.constant 0 : index
    %13 = vector.load %arg4[%c0_7, %c0_8] : memref<128x64xbf16, #tpu.memory_space<vmem>>, vector<128x64xbf16>
    %cst_9 = arith.constant dense<0.000000e+00> : vector<128x64xf32>
    %14 = tpu.matmul %12, %13, %cst_9 {dimension_numbers = #tpu.dot_dimension_numbers<[1], [0], [0], [1], [0, 0, 1, 1], [], []>} : vector<128x128xbf16>, vector<128x64xbf16>, vector<128x64xf32> -> vector<128x64xf32>
    %c0_10 = arith.constant 0 : index
    %c0_11 = arith.constant 0 : index
    %15 = vector.load %arg5[%c0_10, %c0_11] : memref<1x64xf32, #tpu.memory_space<vmem>>, vector<1x64xf32>
    %16 = vector.broadcast %15 : vector<1x64xf32> to vector<128x64xf32>
    %17 = arith.addf %14, %16 : vector<128x64xf32>
    %cst_12 = arith.constant 0.000000e+00 : f32
    %18 = vector.broadcast %cst_12 : f32 to vector<128x64xf32>
    %19 = arith.cmpf ogt, %17, %18 : vector<128x64xf32>
    %cst_13 = arith.constant 2.000000e-01 : f32
    %20 = vector.broadcast %cst_13 : f32 to vector<128x64xf32>
    %21 = arith.mulf %20, %17 : vector<128x64xf32>
    %22 = arith.select %19, %17, %21 : vector<128x64xi1>, vector<128x64xf32>
    %23 = arith.truncf %22 : vector<128x64xf32> to vector<128x64xbf16>
    %c0_14 = arith.constant 0 : index
    %c0_15 = arith.constant 0 : index
    %24 = vector.load %arg6[%c0_14, %c0_15] : memref<64x32xbf16, #tpu.memory_space<vmem>>, vector<64x32xbf16>
    %cst_16 = arith.constant dense<0.000000e+00> : vector<128x32xf32>
    %25 = tpu.matmul %23, %24, %cst_16 {dimension_numbers = #tpu.dot_dimension_numbers<[1], [0], [0], [1], [0, 0, 1, 1], [], []>} : vector<128x64xbf16>, vector<64x32xbf16>, vector<128x32xf32> -> vector<128x32xf32>
    %c0_17 = arith.constant 0 : index
    %c0_18 = arith.constant 0 : index
    %26 = vector.load %arg7[%c0_17, %c0_18] : memref<1x32xf32, #tpu.memory_space<vmem>>, vector<1x32xf32>
    %27 = vector.broadcast %26 : vector<1x32xf32> to vector<128x32xf32>
    %28 = arith.addf %25, %27 : vector<128x32xf32>
    %cst_19 = arith.constant 0.000000e+00 : f32
    %29 = vector.broadcast %cst_19 : f32 to vector<128x32xf32>
    %30 = arith.cmpf ogt, %28, %29 : vector<128x32xf32>
    %cst_20 = arith.constant 2.000000e-01 : f32
    %31 = vector.broadcast %cst_20 : f32 to vector<128x32xf32>
    %32 = arith.mulf %31, %28 : vector<128x32xf32>
    %33 = arith.select %30, %28, %32 : vector<128x32xi1>, vector<128x32xf32>
    %34 = arith.truncf %33 : vector<128x32xf32> to vector<128x32xbf16>
    %c0_21 = arith.constant 0 : index
    %c0_22 = arith.constant 0 : index
    %35 = vector.load %arg8[%c0_21, %c0_22] : memref<32x32xbf16, #tpu.memory_space<vmem>>, vector<32x32xbf16>
    %cst_23 = arith.constant dense<0.000000e+00> : vector<128x32xf32>
    %36 = tpu.matmul %34, %35, %cst_23 {dimension_numbers = #tpu.dot_dimension_numbers<[1], [0], [0], [1], [0, 0, 1, 1], [], []>} : vector<128x32xbf16>, vector<32x32xbf16>, vector<128x32xf32> -> vector<128x32xf32>
    %c0_24 = arith.constant 0 : index
    %c0_25 = arith.constant 0 : index
    %37 = vector.load %arg9[%c0_24, %c0_25] : memref<1x32xf32, #tpu.memory_space<vmem>>, vector<1x32xf32>
    %38 = vector.broadcast %37 : vector<1x32xf32> to vector<128x32xf32>
    %39 = arith.addf %36, %38 : vector<128x32xf32>
    %40 = vector.extract_strided_slice %39 {offsets = [0, 0], sizes = [128, 16], strides = [1, 1]} : vector<128x32xf32> to vector<128x16xf32>
    %41 = vector.extract_strided_slice %39 {offsets = [0, 16], sizes = [128, 16], strides = [1, 1]} : vector<128x32xf32> to vector<128x16xf32>
    %c0_26 = arith.constant 0 : index
    %c0_27 = arith.constant 0 : index
    %42 = vector.load %arg18[%c0_26, %c0_27] : memref<128x16xf32, #tpu.memory_space<vmem>>, vector<128x16xf32>
    %cst_28 = arith.constant 5.000000e-01 : f32
    %43 = vector.broadcast %cst_28 : f32 to vector<128x16xf32>
    %44 = arith.mulf %43, %41 : vector<128x16xf32>
    %45 = math.exp %44 : vector<128x16xf32>
    %46 = arith.mulf %42, %45 : vector<128x16xf32>
    %47 = arith.addf %46, %40 : vector<128x16xf32>
    %48 = arith.truncf %47 : vector<128x16xf32> to vector<128x16xbf16>
    %c0_29 = arith.constant 0 : index
    %c0_30 = arith.constant 0 : index
    %49 = vector.load %arg10[%c0_29, %c0_30] : memref<16x32xbf16, #tpu.memory_space<vmem>>, vector<16x32xbf16>
    %cst_31 = arith.constant dense<0.000000e+00> : vector<128x32xf32>
    %50 = tpu.matmul %48, %49, %cst_31 {dimension_numbers = #tpu.dot_dimension_numbers<[1], [0], [0], [1], [0, 0, 1, 1], [], []>} : vector<128x16xbf16>, vector<16x32xbf16>, vector<128x32xf32> -> vector<128x32xf32>
    %c0_32 = arith.constant 0 : index
    %c0_33 = arith.constant 0 : index
    %51 = vector.load %arg11[%c0_32, %c0_33] : memref<1x32xf32, #tpu.memory_space<vmem>>, vector<1x32xf32>
    %52 = vector.broadcast %51 : vector<1x32xf32> to vector<128x32xf32>
    %53 = arith.addf %50, %52 : vector<128x32xf32>
    %cst_34 = arith.constant 0.000000e+00 : f32
    %54 = vector.broadcast %cst_34 : f32 to vector<128x32xf32>
    %55 = arith.cmpf ogt, %53, %54 : vector<128x32xf32>
    %cst_35 = arith.constant 2.000000e-01 : f32
    %56 = vector.broadcast %cst_35 : f32 to vector<128x32xf32>
    %57 = arith.mulf %56, %53 : vector<128x32xf32>
    %58 = arith.select %55, %53, %57 : vector<128x32xi1>, vector<128x32xf32>
    %59 = arith.truncf %58 : vector<128x32xf32> to vector<128x32xbf16>
    %c0_36 = arith.constant 0 : index
    %c0_37 = arith.constant 0 : index
    %60 = vector.load %arg12[%c0_36, %c0_37] : memref<32x64xbf16, #tpu.memory_space<vmem>>, vector<32x64xbf16>
    %cst_38 = arith.constant dense<0.000000e+00> : vector<128x64xf32>
    %61 = tpu.matmul %59, %60, %cst_38 {dimension_numbers = #tpu.dot_dimension_numbers<[1], [0], [0], [1], [0, 0, 1, 1], [], []>} : vector<128x32xbf16>, vector<32x64xbf16>, vector<128x64xf32> -> vector<128x64xf32>
    %c0_39 = arith.constant 0 : index
    %c0_40 = arith.constant 0 : index
    %62 = vector.load %arg13[%c0_39, %c0_40] : memref<1x64xf32, #tpu.memory_space<vmem>>, vector<1x64xf32>
    %63 = vector.broadcast %62 : vector<1x64xf32> to vector<128x64xf32>
    %64 = arith.addf %61, %63 : vector<128x64xf32>
    %cst_41 = arith.constant 0.000000e+00 : f32
    %65 = vector.broadcast %cst_41 : f32 to vector<128x64xf32>
    %66 = arith.cmpf ogt, %64, %65 : vector<128x64xf32>
    %cst_42 = arith.constant 2.000000e-01 : f32
    %67 = vector.broadcast %cst_42 : f32 to vector<128x64xf32>
    %68 = arith.mulf %67, %64 : vector<128x64xf32>
    %69 = arith.select %66, %64, %68 : vector<128x64xi1>, vector<128x64xf32>
    %70 = arith.truncf %69 : vector<128x64xf32> to vector<128x64xbf16>
    %c0_43 = arith.constant 0 : index
    %c0_44 = arith.constant 0 : index
    %71 = vector.load %arg14[%c0_43, %c0_44] : memref<64x128xbf16, #tpu.memory_space<vmem>>, vector<64x128xbf16>
    %cst_45 = arith.constant dense<0.000000e+00> : vector<128x128xf32>
    %72 = tpu.matmul %70, %71, %cst_45 {dimension_numbers = #tpu.dot_dimension_numbers<[1], [0], [0], [1], [0, 0, 1, 1], [], []>} : vector<128x64xbf16>, vector<64x128xbf16>, vector<128x128xf32> -> vector<128x128xf32>
    %c0_46 = arith.constant 0 : index
    %c0_47 = arith.constant 0 : index
    %73 = vector.load %arg15[%c0_46, %c0_47] : memref<1x128xf32, #tpu.memory_space<vmem>>, vector<1x128xf32>
    %74 = vector.broadcast %73 : vector<1x128xf32> to vector<128x128xf32>
    %75 = arith.addf %72, %74 : vector<128x128xf32>
    %cst_48 = arith.constant 0.000000e+00 : f32
    %76 = vector.broadcast %cst_48 : f32 to vector<128x128xf32>
    %77 = arith.cmpf ogt, %75, %76 : vector<128x128xf32>
    %cst_49 = arith.constant 2.000000e-01 : f32
    %78 = vector.broadcast %cst_49 : f32 to vector<128x128xf32>
    %79 = arith.mulf %78, %75 : vector<128x128xf32>
    %80 = arith.select %77, %75, %79 : vector<128x128xi1>, vector<128x128xf32>
    %81 = arith.truncf %80 : vector<128x128xf32> to vector<128x128xbf16>
    %c0_50 = arith.constant 0 : index
    %c0_51 = arith.constant 0 : index
    %82 = vector.load %arg16[%c0_50, %c0_51] : memref<128x256xbf16, #tpu.memory_space<vmem>>, vector<128x256xbf16>
    %cst_52 = arith.constant dense<0.000000e+00> : vector<128x256xf32>
    %83 = tpu.matmul %81, %82, %cst_52 {dimension_numbers = #tpu.dot_dimension_numbers<[1], [0], [0], [1], [0, 0, 1, 1], [], []>} : vector<128x128xbf16>, vector<128x256xbf16>, vector<128x256xf32> -> vector<128x256xf32>
    %c0_53 = arith.constant 0 : index
    %c0_54 = arith.constant 0 : index
    %84 = vector.load %arg17[%c0_53, %c0_54] : memref<1x256xf32, #tpu.memory_space<vmem>>, vector<1x256xf32>
    %85 = vector.broadcast %84 : vector<1x256xf32> to vector<128x256xf32>
    %86 = arith.addf %83, %85 : vector<128x256xf32>
    %c0_55 = arith.constant 0 : index
    %c0_56 = arith.constant 0 : index
    %87 = vector.load %arg19[%c0_55, %c0_56] : memref<128x256xf32, #tpu.memory_space<vmem>>, vector<128x256xf32>
    tpu.vector_store %arg19[%c0_55, %c0_56], %86 {strides = array<i32>} : memref<128x256xf32, #tpu.memory_space<vmem>>, vector<128x256xf32>,
    %c0_57 = arith.constant 0 : index
    %c0_58 = arith.constant 0 : index
    %88 = vector.load %arg20[%c0_57, %c0_58] : memref<128x32xf32, #tpu.memory_space<vmem>>, vector<128x32xf32>
    tpu.vector_store %arg20[%c0_57, %c0_58], %39 {strides = array<i32>} : memref<128x32xf32, #tpu.memory_space<vmem>>, vector<128x32xf32>,
    return
  }
  func.func @transform_0(%arg0: i32) -> (i32, i32) {
    %c0_i32 = arith.constant 0 : i32
    %c0_i32_0 = arith.constant 0 : i32
    return %arg0, %c0_i32 : i32, i32
  }
  func.func @transform_1(%arg0: i32) -> (i32, i32) {
    %c0_i32 = arith.constant 0 : i32
    %c0_i32_0 = arith.constant 0 : i32
    %c0_i32_1 = arith.constant 0 : i32
    return %c0_i32, %c0_i32_0 : i32, i32
  }
  func.func @transform_2(%arg0: i32) -> (i32, i32) {
    %c0_i32 = arith.constant 0 : i32
    %c0_i32_0 = arith.constant 0 : i32
    %c0_i32_1 = arith.constant 0 : i32
    return %c0_i32, %c0_i32_0 : i32, i32
  }
  func.func @transform_3(%arg0: i32) -> (i32, i32) {
    %c0_i32 = arith.constant 0 : i32
    %c0_i32_0 = arith.constant 0 : i32
    %c0_i32_1 = arith.constant 0 : i32
    return %c0_i32, %c0_i32_0 : i32, i32
  }
  func.func @transform_4(%arg0: i32) -> (i32, i32) {
    %c0_i32 = arith.constant 0 : i32
    %c0_i32_0 = arith.constant 0 : i32
    %c0_i32_1 = arith.constant 0 : i32
    return %c0_i32, %c0_i32_0 : i32, i32
  }
  func.func @transform_5(%arg0: i32) -> (i32, i32) {
    %c0_i32 = arith.constant 0 : i32
    %c0_i32_0 = arith.constant 0 : i32
    %c0_i32_1 = arith.constant 0 : i32
    return %c0_i32, %c0_i32_0 : i32, i32
  }
  func.func @transform_6(%arg0: i32) -> (i32, i32) {
    %c0_i32 = arith.constant 0 : i32
    %c0_i32_0 = arith.constant 0 : i32
    %c0_i32_1 = arith.constant 0 : i32
    return %c0_i32, %c0_i32_0 : i32, i32
  }
  func.func @transform_7(%arg0: i32) -> (i32, i32) {
    %c0_i32 = arith.constant 0 : i32
    %c0_i32_0 = arith.constant 0 : i32
    %c0_i32_1 = arith.constant 0 : i32
    return %c0_i32, %c0_i32_0 : i32, i32
  }
  func.func @transform_8(%arg0: i32) -> (i32, i32) {
    %c0_i32 = arith.constant 0 : i32
    %c0_i32_0 = arith.constant 0 : i32
    %c0_i32_1 = arith.constant 0 : i32
    return %c0_i32, %c0_i32_0 : i32, i32
  }
  func.func @transform_9(%arg0: i32) -> (i32, i32) {
    %c0_i32 = arith.constant 0 : i32
    %c0_i32_0 = arith.constant 0 : i32
    %c0_i32_1 = arith.constant 0 : i32
    return %c0_i32, %c0_i32_0 : i32, i32
  }
  func.func @transform_10(%arg0: i32) -> (i32, i32) {
    %c0_i32 = arith.constant 0 : i32
    %c0_i32_0 = arith.constant 0 : i32
    %c0_i32_1 = arith.constant 0 : i32
    return %c0_i32, %c0_i32_0 : i32, i32
  }
  func.func @transform_11(%arg0: i32) -> (i32, i32) {
    %c0_i32 = arith.constant 0 : i32
    %c0_i32_0 = arith.constant 0 : i32
    %c0_i32_1 = arith.constant 0 : i32
    return %c0_i32, %c0_i32_0 : i32, i32
  }
  func.func @transform_12(%arg0: i32) -> (i32, i32) {
    %c0_i32 = arith.constant 0 : i32
    %c0_i32_0 = arith.constant 0 : i32
    %c0_i32_1 = arith.constant 0 : i32
    return %c0_i32, %c0_i32_0 : i32, i32
  }
  func.func @transform_13(%arg0: i32) -> (i32, i32) {
    %c0_i32 = arith.constant 0 : i32
    %c0_i32_0 = arith.constant 0 : i32
    %c0_i32_1 = arith.constant 0 : i32
    return %c0_i32, %c0_i32_0 : i32, i32
  }
  func.func @transform_14(%arg0: i32) -> (i32, i32) {
    %c0_i32 = arith.constant 0 : i32
    %c0_i32_0 = arith.constant 0 : i32
    %c0_i32_1 = arith.constant 0 : i32
    return %c0_i32, %c0_i32_0 : i32, i32
  }
  func.func @transform_15(%arg0: i32) -> (i32, i32) {
    %c0_i32 = arith.constant 0 : i32
    %c0_i32_0 = arith.constant 0 : i32
    %c0_i32_1 = arith.constant 0 : i32
    return %c0_i32, %c0_i32_0 : i32, i32
  }
  func.func @transform_16(%arg0: i32) -> (i32, i32) {
    %c0_i32 = arith.constant 0 : i32
    %c0_i32_0 = arith.constant 0 : i32
    %c0_i32_1 = arith.constant 0 : i32
    return %c0_i32, %c0_i32_0 : i32, i32
  }
  func.func @transform_17(%arg0: i32) -> (i32, i32) {
    %c0_i32 = arith.constant 0 : i32
    %c0_i32_0 = arith.constant 0 : i32
    return %arg0, %c0_i32 : i32, i32
  }
  func.func @transform_18(%arg0: i32) -> (i32, i32) {
    %c0_i32 = arith.constant 0 : i32
    %c0_i32_0 = arith.constant 0 : i32
    return %arg0, %c0_i32 : i32, i32
  }
  func.func @transform_19(%arg0: i32) -> (i32, i32) {
    %c0_i32 = arith.constant 0 : i32
    %c0_i32_0 = arith.constant 0 : i32
    return %arg0, %c0_i32 : i32, i32
  }
}

</mosaic_0001>

<bundles_post_ra>
// kernel: vae_forward.1
= control target key start
LH: loop header
LB: loop body
LE: loop exit
PB: predicated region body
PF: predicated region fallthrough
CT: control target
= control target key end

     0   :  { %s4335_s0 = inlined_call_operand.hbm [shape: f32[256,256], index: 0, kind: input, shape index: {}]   ;;  %s4336_s1 = inlined_call_operand.vmem [shape: bf16[256,128], index: 1, kind: input, shape index: {}]   ;;  %s4337_s2 = inlined_call_operand.vmem [shape: f32[1,128], index: 2, kind: input, shape index: {}]   ;;  %s4338_s3 = inlined_call_operand.vmem [shape: bf16[128,64], index: 3, kind: input, shape index: {}]   ;;  %s4339_s4 = inlined_call_operand.vmem [shape: f32[1,64], index: 4, kind: input, shape index: {}]   ;;  %s4340_s5 = inlined_call_operand.vmem [shape: bf16[64,32], index: 5, kind: input, shape index: {}]   ;;  %s4341_s6 = inlined_call_operand.vmem [shape: f32[1,32], index: 6, kind: input, shape index: {}]   ;;  %s4342_s7 = inlined_call_operand.vmem [shape: bf16[32,32], index: 7, kind: input, shape index: {}]   ;;  %s4343_s8 = inlined_call_operand.vmem [shape: f32[1,32], index: 8, kind: input, shape index: {}]   ;;  %s4344_s9 = inlined_call_operand.vmem [shape: bf16[16,32], index: 9, kind: input, shape index: {}]   ;;  %s4345_s10 = inlined_call_operand.vmem [shape: f32[1,32], index: 10, kind: input, shape index: {}]   ;;  %s4346_s11 = inlined_call_operand.vmem [shape: bf16[32,64], index: 11, kind: input, shape index: {}]   ;;  %s4347_s12 = inlined_call_operand.vmem [shape: f32[1,64], index: 12, kind: input, shape index: {}]   ;;  %s4348_s13 = inlined_call_operand.vmem [shape: bf16[64,128], index: 13, kind: input, shape index: {}]   ;;  %s4349_s14 = inlined_call_operand.vmem [shape: f32[1,128], index: 14, kind: input, shape index: {}]   ;;  %s4350_s15 = inlined_call_operand.vmem [shape: bf16[128,256], index: 15, kind: input, shape index: {}]   ;;  %s4351_s16 = inlined_call_operand.vmem [shape: f32[1,256], index: 16, kind: input, shape index: {}]   ;;  %s4352_s17 = inlined_call_operand.vmem [shape: f32[256,16], index: 17, kind: input, shape index: {}]   ;;  %s4353_s18 = inlined_call_operand.hbm [shape: f32[256,256], index: 18, kind: output, shape index: {0}]   ;;  %s4354_s19 = inlined_call_operand.vmem [shape: f32[256,32], index: 19, kind: output, shape index: {1}]  }
   0x1   :  { %4368 = sst [smem:[#allocation13_spill]] %s4335_s0 }
   0x2   :  { %4369 = sst [smem:[#allocation14_spill]] %s4336_s1 }
   0x3   :  { %4370 = sst [smem:[#allocation15_spill]] %s4337_s2 }
   0x4   :  { %4371 = sst [smem:[#allocation16_spill]] %s4338_s3 }
   0x5   :  { %4372 = sst [smem:[#allocation17_spill]] %s4339_s4 }
   0x6   :  { %4373 = sst [smem:[#allocation18_spill]] %s4349_s14 }
   0x7   :  { %4374 = sst [smem:[#allocation19_spill]] %s4351_s16 }
   0x8   :  { %4375 = sst [smem:[#allocation20_spill]] %s4353_s18 }
   0x9   :  { %25 = vsyncpa [#allocation3], 0 }
   0xa   :  { %27 = vsyncpa [#allocation3 + $0x1], 0 }
   0xb   :  { %28 = vsyncpa [#allocation4], 0 }
   0xc   :  { %30 = vsyncpa [#allocation4 + $0x1], 0  ;;  %s3525_s0 = smov 0   ;;  %s3527_s30 = smov 0  }
   0xd   :  { %s3529_s20 = smov 0   ;;  %s3531_s21 = smov 0  }
   0xe LB: > { %4376 = sst [smem:[#allocation8_spill]] %s3403_s0  ;;  %s3546_s1 = sadd.s32 4294967295, %s3415_s21   ;;  %s3415_s21 = sphi %s3531_s21, %s4404_s21   ;;  %s3411_s20 = sphi %s3529_s20, %s4406_s20   ;;  %s3407_s30 = sphi %s3527_s30, %s4408_s30   ;;  %s3403_s0 = sphi %s3525_s0, %s4407_s0  }
   0xf   : > { %4377 = sst [smem:[#allocation9_spill]] %s3411_s20  ;;  %s2763_s22 = sadd.s32 4294967294, %s3415_s21  }
  0x10   : > { %s3550_s2 = sadd.s32 1, %s3415_s21   ;;  %s43_s23 = sadd.s32 1, %s3411_s20 }
  0x11   : > { %4378 = sst [smem:[#allocation10_spill]] %s3550_s2  ;;  %s40_s24 = ssub.s32 %s3415_s21, %s3550_s2 }
  0x12   : > { %p50_p0 = scmp.ne.s32.totalorder %s3411_s20, %s3407_s30  ;;  %p41_p1 = scmp.eq.s32.totalorder %s40_s24, 0 }
  0x13   : > { %p51_p2 = scmp.eq.s32.totalorder %s3415_s21, 0  ;;  %p56_p3 = scmp.ne.s32.totalorder %s3407_s30, %s3403_s0 }
  0x14   : > { %p57_p4 = scmp.eq.s32.totalorder %s3546_s1, 0  ;;  %p442_p7 = scmp.eq.s32.totalorder %s3546_s1, 1 }
  0x15   : > { %s3562_s25 = scalar_select %p41_p1, %s3411_s20, %s43_s23  }
  0x16   : > { %p3564_p5 = por %p51_p2, %p50_p0  ;;  %p3568_p6 = por %p57_p4, %p56_p3 }
  0x17   : > { %4379 = sst [smem:[#allocation11_spill]] %s3562_s25  ;;  %p448_p8 = scmp.eq.s32.totalorder %s2763_s22, 1 }
  0x18   : > { %p3186_p10 = scmp.lt.s32.totalorder %s3415_s21, 2  ;;  %p3575_p11 = por %p442_p7, %p50_p0 }
  0x19   : > { %p3579_p12 = por %p448_p8, %p56_p3  ;;  %s542_s29 = sand.u32 1, %s3411_s20  }
  0x1a   : > { %s4382_s27 = scalar_select %p3575_p11, 1, 0 }
  0x1b   : > { %s4384_s28 = scalar_select %p3579_p12, 1, 0 }
  0x1c   : > { %4383 = sst [smem:[#allocation12_spill]] %s4382_s27  ;;  %s2884_s23 = sshll.u32 %s3415_s21, 12 }
  0x1d   : > { %s2766_s24 = sshll.u32 %s542_s29, 8  ;;  %s4385_s0 = sld [smem:[#allocation13_spill]] }
  0x1e   : > { %s546_s22 = scalar_lea.vmem [#allocation2], %s2766_s24  ;;  %p3592_p13 = pnand %p3186_p10, %p3564_p5 }
  0x1f   : > { %s554_s14 = sshll.u32 %s546_s22, 4  ;;  %s3598_s20 = scalar_lea.sflag [#allocation3], %s542_s29  ;;  %s3596_s14 = int_to_ptr.vmem [resolvable:$true] %s554_s14 }
  0x20   : > { %p3321_p1 = pneg %p3592_p13 }
  0x23   : > { %s4386_s18 = smov %s4385_s0  ;;  %s3588_s16 = scalar_lea.hbm %s4385_s0, %s2884_s23 }
  0x24   : > { %s3319_s2 = scalar_lea.hbm %s3588_s16, 4096  ;;  %s3324_s3 = scalar_lea.hbm %s4386_s18, 8192 }
  0x25   : > { %p3320_p0 = scmp.ne.s32.totalorder %s3588_s16, %s3319_s2  ;;  %p3325_p4 = scmp.lt.u32.totalorder %s3588_s16, %s4386_s18 }
  0x26   : > { %p3326_p5 = scmp.lt.u32.totalorder %s3324_s3, %s3319_s2  ;;  %p3328_p8 = scmp.lt.u32.totalorder %s3319_s2, %s3588_s16 }
  0x27   : > { %p3322_p2 = pnand %p3321_p1, %p3320_p0 }
  0x28   : > { %p3327_p7 = por %p3326_p5, %p3325_p4 }
  0x29   : > { %p3323_p3 = pneg %p3322_p2 }
  0x2a   : > { %p3329_p10 = por %p3328_p8, %p3327_p7 }
  0x2c   : > { %p3330_p9 = pnand %p3329_p10, %p3323_p3 }
  0x2e   : > { %3333 = shalt.err (!%p3330_p9)
}
  0x2f   : > { %s3334_s29 = scalar_lea.vmem %s3596_s14, 4096  ;;  %s3417_s22 = smov [#allocation2]  }
  0x30   : > { %p3335_p0 = scmp.ne.s32.totalorder %s3596_s14, %s3334_s29  ;;  %s3339_s0 = sshll.u32 %s3417_s22, 4  ;;  %s3340_s0 = int_to_ptr.vmem [resolvable:$false] %s3339_s0 }
  0x31   : > { %s3341_s25 = scalar_lea.vmem %s3340_s0, 8192  ;;  %p3342_p11 = scmp.lt.s32.totalorder %s3596_s14, %s3340_s0 }
  0x32   : > { %p3337_p2 = pnand %p3335_p0, %p3321_p1  ;;  %p3343_p4 = scmp.lt.s32.totalorder %s3341_s25, %s3334_s29 }
  0x34   : > { %p3338_p12 = pneg %p3337_p2  ;;  %p3344_p5 = por %p3343_p4, %p3342_p11 }
  0x36   : > { %p3345_p7 = pnand %p3344_p5, %p3338_p12 }
  0x38   : > { %3348 = shalt.err (!%p3345_p7)
}
  0x39   : > { %s3418_s2 = smov 256   ;;  %s3419_s3 = smov 16  }
  0x3a   : > { %3181 = dma.hbm_to_vmem [thread:$0]  (!%p3592_p13), %s3588_s16, 4096, %s3596_s14, %s3598_s20, %s3418_s2, %s3418_s2, %s3419_s3  }
  0x3b   : > { %p2770_p9 = scmp.ge.s32.totalorder %s3415_s21, 1  ;;  %p571_p1 = scmp.lt.s32.totalorder %s3415_s21, 3 }
  0x3d   : > { %p572_p3 = pnand %p2770_p9, %p571_p1 }
  0x3e   : > { %s3629_s23 = sand.u32 (!%p572_p3), 1, %s3407_s30  }
  0x3f   : > { %575 = sbr.rel (%p572_p3) target bundleno = 2102 (0x836), region = 92  ;;  %s4366_s24 = sshll.u32 (!%p572_p3), %s3629_s23, 8 }
  0x40   : > { %s578_s29 = scalar_lea.sflag (!%p572_p3), [#allocation3], %s3629_s23  ;;  %s3635_s22 = scalar_lea.vmem (!%p572_p3), [#allocation2], %s4366_s24 }
  0x46   : > { %3394 = dma.done.wait (%p3568_p6), %s578_s29, 4096  }
  0x47   : > { %3396 = vsyncadd (%p3568_p6), %s578_s29, 4294963200  ;;  %s4388_s20 = sld [smem:[#allocation14_spill]]  ;;  %v662_v11 = vld [vmem:[%s3635_s22 + $0x8] sm:$0xff]  ;;  %v664_v12 = vld [vmem:[%s3635_s22 + $0x18] sm:$0xff]  ;;  %s4392_s14 = sld [smem:[#allocation15_spill]] }
  0x48   : > { %v694_v13 = vpack.c.bf16 %v664_v12, %v662_v11  ;;  %v678_v15 = vld [vmem:[%s3635_s22 + $0x88] sm:$0xff]  ;;  %v680_v16 = vld [vmem:[%s3635_s22 + $0x98] sm:$0xff]  ;;  %v661_v22 = vld [vmem:[%s3635_s22] sm:$0xff]  ;;  %s4393_s4 = sld [smem:[#allocation17_spill]]  ;;  %s2773_s25 = sshll.u32 %s3546_s1, 4 }
  0x49   : > { %v702_v18 = vpack.c.bf16 %v680_v16, %v678_v15  ;;  %v663_v23 = vld [vmem:[%s3635_s22 + $0x10] sm:$0xff]  ;;  %v666_v24 = vld [vmem:[%s3635_s22 + $0x28] sm:$0xff]  ;;  %v668_v25 = vld [vmem:[%s3635_s22 + $0x38] sm:$0xff]  ;;  %p648_p6 = scmp.lt.s32.totalorder %s2773_s25, 31  ;;  %s4395_s0 = sld [smem:[#allocation19_spill]] }
  0x4a   : > { %876 = vmatprep.mubr.bf16.mxu0 %v694_v13  ;;  %v677_v26 = vld [vmem:[%s3635_s22 + $0x80] sm:$0xff]  ;;  %v679_v27 = vld [vmem:[%s3635_s22 + $0x90] sm:$0xff]  ;;  %v682_v28 = vld [vmem:[%s3635_s22 + $0xa8] sm:$0xff]  ;;  %v693_v31 = vpack.c.bf16 %v663_v23, %v661_v22  ;;  %v696_v32 = vpack.c.bf16 %v668_v25, %v666_v24  ;;  %s4396_s24 = sshll.u32 %s3629_s23, 8  ;;  %s2886_s26 = sshll.u32 %s3546_s1, 12 }
  0x4b   : > { %908 = vmatprep.mubr.bf16.mxu1 %v702_v18  ;;  %v684_v29 = vld [vmem:[%s3635_s22 + $0xb8] sm:$0xff]  ;;  %v701_v33 = vpack.c.bf16 %v679_v27, %v677_v26  ;;  %v665_v36 = vld [vmem:[%s3635_s22 + $0x20] sm:$0xff]  ;;  %v667_v37 = vld [vmem:[%s3635_s22 + $0x30] sm:$0xff]  ;;  %s4410_s25 = smov (!%p648_p6, %s2773_s25), 31  ;;  %s4220_s3 = scalar_lea.vmem [#allocation5], %s4396_s24 }
  0x4c   : > { %v704_v35 = vpack.c.bf16 %v684_v29, %v682_v28  ;;  %v670_v38 = vld [vmem:[%s3635_s22 + $0x48] sm:$0xff]  ;;  %v672_v39 = vld [vmem:[%s3635_s22 + $0x58] sm:$0xff]  ;;  %v681_v40 = vld [vmem:[%s3635_s22 + $0xa0] sm:$0xff]  ;;  %v695_v45 = vpack.c.bf16 %v667_v37, %v665_v36  ;;  %s2774_s2 = sshll.u32 %s4410_s25, 3  ;;  %s2649_s29 = sshll.u32 %s4220_s3, 4  ;;  %s4287_s29 = int_to_ptr.vmem [resolvable:$true] %s2649_s29 }
  0x4d   : > { %s4389_s27 = smov %s4388_s20  ;;  %v3226_v0 = vld [vmem:[%s4388_s20 + $0x40] sm:$0xff]   ;;  %s4390_s20 = sld [smem:[#allocation16_spill]]  ;;  %v683_v41 = vld [vmem:[%s3635_s22 + $0xb0] sm:$0xff]  ;;  %v686_v42 = vld [vmem:[%s3635_s22 + $0xc8] sm:$0xff]  ;;  %v698_v46 = vpack.c.bf16 %v672_v39, %v670_v38 }
  0x4e   : > { %v3227_v1 = vld [vmem:[%s4389_s27] sm:$0xff]   ;;  %2887 = vmatprep.subr.bf16.mxu0 %v3226_v0  ;;  %v3228_v2 = vld [vmem:[%s4389_s27 + $0x48] sm:$0xff]   ;;  %3158 = vmatprep.subr.bf16.mxu1 %v3226_v0  ;;  %v3230_v4 = vld [vmem:[%s4389_s27 + $0x50] sm:$0xff]   ;;  %v703_v47 = vpack.c.bf16 %v683_v41, %v681_v40  ;;  %s3879_s16 = scalar_lea.vmem %s4354_s19, %s2774_s2 }
  0x4f   : > { %2888 = vmatpush3.bf16.msra.mxu0 %v3227_v1  ;;  %v3229_v3 = vld [vmem:[%s4389_s27 + $0x8] sm:$0xff]   ;;  %3166 = vmatpush3.bf16.msra.mxu1 %v3227_v1  ;;  %v3231_v5 = vld [vmem:[%s4389_s27 + $0x10] sm:$0xff]   ;;  %v3232_v6 = vld [vmem:[%s4389_s27 + $0x58] sm:$0xff]  }
  0x50   : > { %2889 = vmatprep.subr.bf16.mxu0 %v3228_v2  ;;  %3159 = vmatprep.subr.bf16.mxu1 %v3228_v2  ;;  %v3233_v7 = vld [vmem:[%s4389_s27 + $0x18] sm:$0xff]   ;;  %v3234_v8 = vld [vmem:[%s4389_s27 + $0x60] sm:$0xff]   ;;  %v3236_v10 = vld [vmem:[%s4389_s27 + $0x68] sm:$0xff]  }
  0x51   : > { %v3235_v9 = vld [vmem:[%s4389_s27 + $0x20] sm:$0xff]   ;;  %v3237_v14 = vld [vmem:[%s4389_s27 + $0x28] sm:$0xff]   ;;  %v3238_v17 = vld [vmem:[%s4389_s27 + $0x70] sm:$0xff]  }
  0x52   : > { %v3239_v19 = vld [vmem:[%s4389_s27 + $0x30] sm:$0xff]   ;;  %v3240_v20 = vld [vmem:[%s4389_s27 + $0x78] sm:$0xff]   ;;  %v669_v49 = vld [vmem:[%s3635_s22 + $0x40] sm:$0xff] }
  0x53   : > { %2890 = vmatpush3.bf16.msra.mxu0 %v3229_v3  ;;  %3167 = vmatpush3.bf16.msra.mxu1 %v3229_v3  ;;  %v3241_v21 = vld [vmem:[%s4389_s27 + $0x38] sm:$0xff]   ;;  %s4391_s18 = smov %s4390_s20  ;;  %v3242_v30 = vld [vmem:[%s4390_s20] sm:$0xff]   ;;  %v671_v50 = vld [vmem:[%s3635_s22 + $0x50] sm:$0xff]  ;;  %s3420_s20 = smov 112  }
  0x54   : > { %2891 = vmatprep.subr.bf16.mxu0 %v3230_v4  ;;  %3160 = vmatprep.subr.bf16.mxu1 %v3230_v4  ;;  %v3243_v34 = vld [vmem:[%s4391_s18 + $0x8] sm:$0xff]   ;;  %v688_v43 = vld [vmem:[%s3635_s22 + $0xd8] sm:$0xff]  ;;  %v3244_v44 = vld [vmem:[%s4391_s18 + $0x10] sm:$0xff]   ;;  %v697_v57 = vpack.c.bf16 %v671_v50, %v669_v49 }
  0x55   : > { %v706_v48 = vpack.c.bf16 %v688_v43, %v686_v42  ;;  %v674_v51 = vld [vmem:[%s3635_s22 + $0x68] sm:$0xff]  ;;  %v676_v52 = vld [vmem:[%s3635_s22 + $0x78] sm:$0xff]  ;;  %v685_v53 = vld [vmem:[%s3635_s22 + $0xc0] sm:$0xff] }
  0x56   : > { %v687_v54 = vld [vmem:[%s3635_s22 + $0xd0] sm:$0xff]  ;;  %v690_v55 = vld [vmem:[%s3635_s22 + $0xe8] sm:$0xff]  ;;  %v692_v56 = vld [vmem:[%s3635_s22 + $0xf8] sm:$0xff]  ;;  %v700_v58 = vpack.c.bf16 %v676_v52, %v674_v51 }
  0x57   : > { %2892 = vmatpush3.bf16.msra.mxu0 %v3231_v5  ;;  %3168 = vmatpush3.bf16.msra.mxu1 %v3231_v5  ;;  %v705_v59 = vpack.c.bf16 %v687_v54, %v685_v53  ;;  %v708_v60 = vpack.c.bf16 %v692_v56, %v690_v55  ;;  %v673_v61 = vld [vmem:[%s3635_s22 + $0x60] sm:$0xff]  ;;  %v675_v62 = vld [vmem:[%s3635_s22 + $0x70] sm:$0xff]  ;;  %v3245_v3 = vld [vmem:[%s4391_s18 + $0x18] sm:$0xff]  }
  0x58   : > { %2893 = vmatprep.subr.bf16.mxu0 %v3232_v6  ;;  %3161 = vmatprep.subr.bf16.mxu1 %v3232_v6  ;;  %v689_v63 = vld [vmem:[%s3635_s22 + $0xe0] sm:$0xff]  ;;  %v691_v0 = vld [vmem:[%s3635_s22 + $0xf0] sm:$0xff]  ;;  %v699_v1 = vpack.c.bf16 %v675_v62, %v673_v61  ;;  %v3247_v5 = vld [vmem:[%s4391_s18 + $0x28] sm:$0xff]   ;;  %s3349_s22 = scalar_lea.vmem %s4287_s29, 4096 }
  0x59   : > { %v707_v2 = vpack.c.bf16 %v691_v0, %v689_v63  ;;  %v3246_v4 = vld [vmem:[%s4391_s18 + $0x20] sm:$0xff]   ;;  %v3248_v6 = vld [vmem:[%s4391_s18 + $0x30] sm:$0xff]   ;;  %p3350_p11 = scmp.ne.s32.totalorder %s4287_s29, %s3349_s22 }
  0x5b   : > { %2894 = vmatpush3.bf16.msra.mxu0 %v3233_v7  ;;  %3169 = vmatpush3.bf16.msra.mxu1 %v3233_v7  ;;  %v3249_v7 = vld [vmem:[%s4391_s18 + $0x38] sm:$0xff]  }
  0x5c   : > { %2895 = vmatprep.subr.bf16.mxu0 %v3234_v8  ;;  %3162 = vmatprep.subr.bf16.mxu1 %v3234_v8  ;;  %v3748_v8 = vld [vmem:[%s4340_s5] sm:$0xff]  }
  0x5f   : > { %2896 = vmatpush3.bf16.msra.mxu0 %v3235_v9  ;;  %3170 = vmatpush3.bf16.msra.mxu1 %v3235_v9 }
  0x60   : > { %2897 = vmatprep.subr.bf16.mxu0 %v3236_v10  ;;  %3163 = vmatprep.subr.bf16.mxu1 %v3236_v10  ;;  %v3754_v10 = vld [vmem:[%s4392_s14] ss:$0 sm:$0xff]  ;;  %s4020_s14 = scalar_lea.vmem %s4352_s17, %s2774_s2 }
  0x63   : > { %2898 = vmatpush3.bf16.msra.mxu0 %v3237_v14  ;;  %3171 = vmatpush3.bf16.msra.mxu1 %v3237_v14 }
  0x64   : > { %2899 = vmatprep.subr.bf16.mxu0 %v3238_v17  ;;  %3164 = vmatprep.subr.bf16.mxu1 %v3238_v17 }
  0x67   : > { %2900 = vmatpush3.bf16.msra.mxu0 %v3239_v19  ;;  %3172 = vmatpush3.bf16.msra.mxu1 %v3239_v19 }
  0x68   : > { %2901 = vmatprep.subr.bf16.mxu0 %v3240_v20  ;;  %3165 = vmatprep.subr.bf16.mxu1 %v3240_v20 }
  0x6b   : > { %2902 = vmatpush3.bf16.msra.mxu0 %v3241_v21  ;;  %3173 = vmatpush3.bf16.msra.mxu1 %v3241_v21 }
  0x6c   : > { %3020 = vmatprep.subr.bf16.mxu1 %v3242_v30 }
  0x6e   : > { %877 = vmatmul.mubr.bf16.vlgmr.msra.gmra.mrb[0].mxu0 %v693_v31  ;;  %909 = vmatmul.mubr.bf16.vlgmr.msra.gmra.mrb[0].mxu1 %v701_v33 }
  0x6f   : > { %884 = vmatprep.mubr.bf16.mxu0 %v696_v32  ;;  %916 = vmatprep.mubr.bf16.mxu1 %v704_v35 }
  0x70   : > { %3021 = vmatpush3.bf16.msra.mxu1 %v3242_v30 }
  0x71   : > { %3022 = vmatprep.subr.bf16.mxu1 %v3243_v34 }
  0x74   : > { %3023 = vmatpush3.bf16.msra.mxu1 %v3243_v34 }
  0x75   : > { %3024 = vmatprep.subr.bf16.mxu1 %v3244_v44 }
  0x76   : > { %885 = vmatmul.mubr.bf16.gmra.mrb[4].mxu0 %v695_v45  ;;  %917 = vmatmul.mubr.bf16.gmra.mrb[4].mxu1 %v703_v47 }
  0x77   : > { %892 = vmatprep.mubr.bf16.mxu0 %v698_v46  ;;  %924 = vmatprep.mubr.bf16.mxu1 %v706_v48 }
  0x78   : > { %3025 = vmatpush3.bf16.msra.mxu1 %v3244_v44 }
  0x79   : > { %3026 = vmatprep.subr.bf16.mxu1 %v3245_v3 }
  0x7c   : > { %3027 = vmatpush3.bf16.msra.mxu1 %v3245_v3 }
  0x7d   : > { %3028 = vmatprep.subr.bf16.mxu1 %v3246_v4 }
  0x7e   : > { %893 = vmatmul.mubr.bf16.gmra.mrb[8].mxu0 %v697_v57  ;;  %925 = vmatmul.mubr.bf16.gmra.mrb[8].mxu1 %v705_v59 }
  0x7f   : > { %900 = vmatprep.mubr.bf16.mxu0 %v700_v58  ;;  %932 = vmatprep.mubr.bf16.mxu1 %v708_v60 }
  0x80   : > { %3029 = vmatpush3.bf16.msra.mxu1 %v3246_v4 }
  0x81   : > { %3030 = vmatprep.subr.bf16.mxu1 %v3247_v5 }
  0x84   : > { %3031 = vmatpush3.bf16.msra.mxu1 %v3247_v5 }
  0x85   : > { %3032 = vmatprep.subr.bf16.mxu1 %v3248_v6 }
  0x86   : > { %901 = vmatmul.mubr.bf16.gmra.mrb[12].mxu0 %v699_v1  ;;  %933 = vmatmul.mubr.bf16.gmra.mrb[12].mxu1 %v707_v2 }
  0x88   : > { %3033 = vmatpush3.bf16.msra.mxu1 %v3248_v6  ;;  %v3251_v6 = vld [vmem:[%s4340_s5 + $0x8] sm:$0xff]  }
  0x89   : > { %3034 = vmatprep.subr.bf16.mxu1 %v3249_v7 }
  0x8c   : > { %3035 = vmatpush3.bf16.msra.mxu1 %v3249_v7 }
  0x8d   : > { %3052 = vmatprep.subr.bf16.mxu1 %v3748_v8 }
 0x141   : > { %v2903_v9 = vpop.f32.mrb[0].mxu0  ;;  %v2927_v12 = vpop.f32.mrb[0].mxu1 }
 0x142   : > { %v2904_v11 = vpop.f32.mrb[1].mxu0  ;;  %v2928_v15 = vpop.f32.mrb[1].mxu1 }
 0x143   : > { %v2905_v13 = vadd.f32 %v2904_v11, %v2903_v9  ;;  %v2906_v14 = vpop.f32.mrb[2].mxu0  ;;  %v2929_v17 = vadd.f32 %v2928_v15, %v2927_v12  ;;  %v2930_v18 = vpop.f32.mrb[2].mxu1 }
 0x144   : > { %v2907_v16 = vpop.f32.mrb[3].mxu0  ;;  %v2931_v21 = vpop.f32.mrb[3].mxu1 }
 0x145   : > { %v879_v19 = vadd.f32 %v2905_v13, %v3754_v10  ;;  %v2908_v20 = vadd.f32 %v2907_v16, %v2906_v14  ;;  %v911_v22 = vadd.f32 %v2929_v17, %v3754_v10  ;;  %v2932_v23 = vadd.f32 %v2931_v21, %v2930_v18 }
 0x147   : > { %v957_v24 = vmul.f32 0.2, %v879_v19  ;;  %v882_v25 = vadd.f32 %v2908_v20, %v3754_v10  ;;  %vm941_vm0 = vcmp.gt.f32.partialorder %v879_v19, 0.0  ;;  %vm949_vm1 = vcmp.gt.f32.partialorder %v911_v22, 0.0 }
 0x148   : > { %v965_v26 = vmul.f32 0.2, %v911_v22  ;;  %v914_v27 = vadd.f32 %v2932_v23, %v3754_v10 }
 0x149   : > { %vm942_vm2 = vcmp.gt.f32.partialorder %v882_v25, 0.0  ;;  %v958_v28 = vmul.f32 0.2, %v882_v25  ;;  %v2909_v29 = vpop.f32.mrb[4].mxu0  ;;  %v2933_v32 = vpop.f32.mrb[4].mxu1  ;;  %v973_v36 = vsel %vm941_vm0, %v879_v19, %v957_v24  ;;  %v3252_v19 = vld [vmem:[%s4340_s5 + $0x10] sm:$0xff]  }
 0x14a   : > { %v2910_v30 = vpop.f32.mrb[5].mxu0  ;;  %vm950_vm3 = vcmp.gt.f32.partialorder %v914_v27, 0.0  ;;  %v966_v31 = vmul.f32 0.2, %v914_v27  ;;  %v3760_v33 = vsel %vm949_vm1, %v911_v22, %v965_v26  ;;  %v2934_v38 = vpop.f32.mrb[5].mxu1 }
 0x14b   : > { %v2911_v34 = vadd.f32 %v2910_v30, %v2909_v29  ;;  %v2912_v35 = vpop.f32.mrb[6].mxu0  ;;  %v974_v37 = vsel %vm942_vm2, %v882_v25, %v958_v28  ;;  %v2935_v41 = vadd.f32 %v2934_v38, %v2933_v32  ;;  %v2936_v42 = vpop.f32.mrb[6].mxu1 }
 0x14c   : > { %v2913_v39 = vpop.f32.mrb[7].mxu0  ;;  %v989_v40 = vpack.c.bf16 %v974_v37, %v973_v36  ;;  %v3762_v43 = vsel %vm950_vm3, %v914_v27, %v966_v31  ;;  %v2937_v46 = vpop.f32.mrb[7].mxu1 }
 0x14d   : > { %v887_v44 = vadd.f32 %v2911_v34, %v3754_v10  ;;  %v2914_v45 = vadd.f32 %v2913_v39, %v2912_v35  ;;  %v993_v47 = vpack.c.bf16 %v3762_v43, %v3760_v33  ;;  %v919_v48 = vadd.f32 %v2935_v41, %v3754_v10  ;;  %v3807_v33 = vld [vmem:[%s4393_s4] ss:$0 sm:$0xff] }
 0x14e   : > { %3036 = vmatprep.mubr.bf16.mxu1 %v989_v40  ;;  %v2938_v49 = vadd.f32 %v2937_v46, %v2936_v42 }
 0x14f   : > { %v959_v50 = vmul.f32 0.2, %v887_v44  ;;  %v890_v51 = vadd.f32 %v2914_v45, %v3754_v10  ;;  %vm943_vm4 = vcmp.gt.f32.partialorder %v887_v44, 0.0  ;;  %vm951_vm5 = vcmp.gt.f32.partialorder %v919_v48, 0.0 }
 0x150   : > { %v967_v52 = vmul.f32 0.2, %v919_v48  ;;  %v922_v53 = vadd.f32 %v2938_v49, %v3754_v10 }
 0x151   : > { %vm944_vm6 = vcmp.gt.f32.partialorder %v890_v51, 0.0  ;;  %v960_v54 = vmul.f32 0.2, %v890_v51  ;;  %v2915_v55 = vpop.f32.mrb[8].mxu0  ;;  %v2939_v58 = vpop.f32.mrb[8].mxu1  ;;  %v975_v60 = vsel %vm943_vm4, %v887_v44, %v959_v50  ;;  %vm1260_vm4 = vcmask 523264  }
 0x152   : > { %v2916_v56 = vpop.f32.mrb[9].mxu0  ;;  %vm952_vm7 = vcmp.gt.f32.partialorder %v922_v53, 0.0  ;;  %v968_v57 = vmul.f32 0.2, %v922_v53  ;;  %v3770_v59 = vsel %vm951_vm5, %v919_v48, %v967_v52  ;;  %v2940_v0 = vpop.f32.mrb[9].mxu1 }
 0x153   : > { %v976_v61 = vsel %vm944_vm6, %v890_v51, %v960_v54  ;;  %v2917_v62 = vadd.f32 %v2916_v56, %v2915_v55  ;;  %v2918_v63 = vpop.f32.mrb[10].mxu0  ;;  %v2941_v3 = vadd.f32 %v2940_v0, %v2939_v58  ;;  %v2942_v4 = vpop.f32.mrb[10].mxu1  ;;  %v3254_v56 = vld [vmem:[%s4342_s7] sm:$0xff]  }
 0x154   : > { %v990_v1 = vpack.c.bf16 %v976_v61, %v975_v60  ;;  %v2919_v2 = vpop.f32.mrb[11].mxu0  ;;  %v3772_v5 = vsel %vm952_vm7, %v922_v53, %v968_v57  ;;  %v2943_v11 = vpop.f32.mrb[11].mxu1  ;;  %v3255_v57 = vld [vmem:[%s4342_s7 + $0x8] sm:$0xff]   ;;  %3076 = vmatprep.subr.bf16.mxu0 %v3254_v56 }
 0x155   : > { %v895_v7 = vadd.f32 %v2917_v62, %v3754_v10  ;;  %v2920_v9 = vadd.f32 %v2919_v2, %v2918_v63  ;;  %v994_v12 = vpack.c.bf16 %v3772_v5, %v3770_v59  ;;  %v927_v13 = vadd.f32 %v2941_v3, %v3754_v10  ;;  %3077 = vmatpush3.bf16.msra.mxu0 %v3254_v56 }
 0x156   : > { %3037 = vmatmul.mubr.bf16.vlgmr.msra.gmra.mrb[16].mxu1 %v990_v1  ;;  %v2944_v14 = vadd.f32 %v2943_v11, %v2942_v4  ;;  %3078 = vmatprep.subr.bf16.mxu0 %v3255_v57 }
 0x157   : > { %v961_v15 = vmul.f32 0.2, %v895_v7  ;;  %v898_v16 = vadd.f32 %v2920_v9, %v3754_v10  ;;  %3053 = vmatpush3.bf16.msra.mxu1 %v3748_v8  ;;  %vm945_vm8 = vcmp.gt.f32.partialorder %v895_v7, 0.0  ;;  %vm953_vm9 = vcmp.gt.f32.partialorder %v927_v13, 0.0 }
 0x158   : > { %v969_v17 = vmul.f32 0.2, %v927_v13  ;;  %v930_v18 = vadd.f32 %v2944_v14, %v3754_v10  ;;  %3054 = vmatprep.subr.bf16.mxu1 %v3251_v6 }
 0x159   : > { %vm946_vm10 = vcmp.gt.f32.partialorder %v898_v16, 0.0  ;;  %v962_v20 = vmul.f32 0.2, %v898_v16  ;;  %v2921_v21 = vpop.f32.mrb[12].mxu0  ;;  %v2945_v24 = vpop.f32.mrb[12].mxu1  ;;  %v977_v27 = vsel %vm945_vm8, %v895_v7, %v961_v15  ;;  %3079 = vmatpush3.bf16.msra.mxu0 %v3255_v57 }
 0x15a   : > { %v2922_v22 = vpop.f32.mrb[13].mxu0  ;;  %vm954_vm11 = vcmp.gt.f32.partialorder %v930_v18, 0.0  ;;  %v970_v23 = vmul.f32 0.2, %v930_v18  ;;  %v985_v25 = vsel %vm953_vm9, %v927_v13, %v969_v17  ;;  %v2946_v29 = vpop.f32.mrb[13].mxu1 }
 0x15b   : > { %v2923_v26 = vadd.f32 %v2922_v22, %v2921_v21  ;;  %v2924_v8 = vpop.f32.mrb[14].mxu0  ;;  %v978_v28 = vsel %vm946_vm10, %v898_v16, %v962_v20  ;;  %3055 = vmatpush3.bf16.msra.mxu1 %v3251_v6  ;;  %v2947_v32 = vadd.f32 %v2946_v29, %v2945_v24  ;;  %v2948_v34 = vpop.f32.mrb[14].mxu1 }
 0x15c   : > { %v2925_v30 = vpop.f32.mrb[15].mxu0  ;;  %v991_v31 = vpack.c.bf16 %v978_v28, %v977_v27  ;;  %v986_v35 = vsel %vm954_vm11, %v930_v18, %v970_v23  ;;  %3056 = vmatprep.subr.bf16.mxu1 %v3252_v19  ;;  %v2949_v38 = vpop.f32.mrb[15].mxu1 }
 0x15d   : > { %v903_v36 = vadd.f32 %v2923_v26, %v3754_v10  ;;  %v2926_v37 = vadd.f32 %v2925_v30, %v2924_v8  ;;  %v995_v39 = vpack.c.bf16 %v986_v35, %v985_v25  ;;  %v935_v40 = vadd.f32 %v2947_v32, %v3754_v10 }
 0x15e   : > { %3040 = vmatprep.mubr.bf16.mxu1 %v991_v31  ;;  %v2950_v41 = vadd.f32 %v2949_v38, %v2948_v34 }
 0x15f   : > { %v963_v42 = vmul.f32 0.2, %v903_v36  ;;  %v906_v44 = vadd.f32 %v2926_v37, %v3754_v10  ;;  %3057 = vmatpush3.bf16.msra.mxu1 %v3252_v19  ;;  %vm947_vm12 = vcmp.gt.f32.partialorder %v903_v36, 0.0  ;;  %vm955_vm13 = vcmp.gt.f32.partialorder %v935_v40, 0.0 }
 0x160   : > { %v971_v45 = vmul.f32 0.2, %v935_v40  ;;  %v938_v46 = vadd.f32 %v2950_v41, %v3754_v10  ;;  %v3253_v10 = vld [vmem:[%s4340_s5 + $0x18] sm:$0xff]  }
 0x161   : > { %vm948_vm14 = vcmp.gt.f32.partialorder %v906_v44, 0.0  ;;  %v964_v48 = vmul.f32 0.2, %v906_v44  ;;  %v979_v51 = vsel %vm947_vm12, %v903_v36, %v963_v42  ;;  %3058 = vmatprep.subr.bf16.mxu1 %v3253_v10 }
 0x162   : > { %vm956_vm15 = vcmp.gt.f32.partialorder %v938_v46, 0.0  ;;  %v972_v49 = vmul.f32 0.2, %v938_v46  ;;  %v987_v50 = vsel %vm955_vm13, %v935_v40, %v971_v45 }
 0x163   : > { %v980_v52 = vsel %vm948_vm14, %v906_v44, %v964_v48  ;;  %3059 = vmatpush3.bf16.msra.mxu1 %v3253_v10 }
 0x164   : > { %v992_v53 = vpack.c.bf16 %v980_v52, %v979_v51  ;;  %v988_v54 = vsel %vm956_vm15, %v938_v46, %v972_v49 }
 0x165   : > { %v996_v55 = vpack.c.bf16 %v988_v54, %v987_v50 }
 0x166   : > { %3041 = vmatmul.mubr.bf16.gmra.mrb[20].mxu1 %v992_v53 }
 0x167   : > { %3044 = vmatprep.mubr.bf16.mxu1 %v993_v47 }
 0x16e   : > { %3045 = vmatmul.mubr.bf16.gmra.mrb[24].mxu1 %v994_v12 }
 0x16f   : > { %3048 = vmatprep.mubr.bf16.mxu1 %v995_v39 }
 0x176   : > { %3049 = vmatmul.mubr.bf16.gmra.mrb[28].mxu1 %v996_v55 }
 0x229   : > { %v3038_v43 = vpop.f32.mrb[16].mxu1 }
 0x22a   : > { %v1111_v47 = vadd.f32 %v3038_v43, %v3807_v33  ;;  %v1102_v58 = vpop.f32.mrb[17].mxu1 }
 0x22b   : > { %v1103_v59 = vadd.f32 %v3807_v33, %v1102_v58  ;;  %v3039_v60 = vpop.f32.mrb[18].mxu1 }
 0x22c   : > { %v1183_v61 = vmul.f32 0.2, %v1111_v47  ;;  %v1114_v62 = vadd.f32 %v3039_v60, %v3807_v33  ;;  %v1105_v63 = vpop.f32.mrb[19].mxu1  ;;  %vm1167_vm0 = vcmp.gt.f32.partialorder %v1111_v47, 0.0 }
 0x22d   : > { %v1181_v0 = vmul.f32 0.2, %v1103_v59  ;;  %v1106_v1 = vadd.f32 %v3807_v33, %v1105_v63  ;;  %vm1165_vm1 = vcmp.gt.f32.partialorder %v1103_v59, 0.0 }
 0x22e   : > { %vm1168_vm2 = vcmp.gt.f32.partialorder %v1114_v62, 0.0  ;;  %v1184_v2 = vmul.f32 0.2, %v1114_v62  ;;  %v1199_v4 = vsel %vm1167_vm0, %v1111_v47, %v1183_v61 }
 0x22f   : > { %vm1166_vm3 = vcmp.gt.f32.partialorder %v1106_v1, 0.0  ;;  %v1182_v3 = vmul.f32 0.2, %v1106_v1  ;;  %v1197_v6 = vsel %vm1165_vm1, %v1103_v59, %v1181_v0 }
 0x230   : > { %v1200_v5 = vsel %vm1168_vm2, %v1114_v62, %v1184_v2 }
 0x231   : > { %v1214_v7 = vpack.c.bf16 %v1200_v5, %v1199_v4  ;;  %v1198_v9 = vsel %vm1166_vm3, %v1106_v1, %v1182_v3 }
 0x232   : > { %v1213_v11 = vpack.c.bf16 %v1198_v9, %v1197_v6 }
 0x234   : > { %3060 = vmatprep.mubr.msk.bf16.mxu1 %vm1260_vm4, %v1213_v11 }
 0x235   : > { %3061 = vmatmul.mubr.msk.bf16.vlgmr.msra.gmra.mrb[32].mxu1 %vm1260_vm4, %v1214_v7 }
 0x239   : > { %v3042_v12 = vpop.f32.mrb[20].mxu1 }
 0x23a   : > { %v1127_v13 = vadd.f32 %v3042_v12, %v3807_v33  ;;  %v1118_v14 = vpop.f32.mrb[21].mxu1 }
 0x23b   : > { %v1119_v15 = vadd.f32 %v3807_v33, %v1118_v14  ;;  %v3043_v16 = vpop.f32.mrb[22].mxu1 }
 0x23c   : > { %v1187_v17 = vmul.f32 0.2, %v1127_v13  ;;  %v1130_v18 = vadd.f32 %v3043_v16, %v3807_v33  ;;  %v1121_v19 = vpop.f32.mrb[23].mxu1  ;;  %vm1171_vm5 = vcmp.gt.f32.partialorder %v1127_v13, 0.0 }
 0x23d   : > { %v1185_v20 = vmul.f32 0.2, %v1119_v15  ;;  %v1122_v21 = vadd.f32 %v3807_v33, %v1121_v19  ;;  %vm1169_vm6 = vcmp.gt.f32.partialorder %v1119_v15, 0.0 }
 0x23e   : > { %vm1172_vm7 = vcmp.gt.f32.partialorder %v1130_v18, 0.0  ;;  %v1188_v22 = vmul.f32 0.2, %v1130_v18  ;;  %v1203_v24 = vsel %vm1171_vm5, %v1127_v13, %v1187_v17 }
 0x23f   : > { %vm1170_vm8 = vcmp.gt.f32.partialorder %v1122_v21, 0.0  ;;  %v1186_v23 = vmul.f32 0.2, %v1122_v21  ;;  %v1201_v26 = vsel %vm1169_vm6, %v1119_v15, %v1185_v20  ;;  %vm1461_vm6 = vcmask 261120  }
 0x240   : > { %v1204_v25 = vsel %vm1172_vm7, %v1130_v18, %v1188_v22 }
 0x241   : > { %v1216_v8 = vpack.c.bf16 %v1204_v25, %v1203_v24  ;;  %v1202_v27 = vsel %vm1170_vm8, %v1122_v21, %v1186_v23  ;;  %v3046_v28 = vpop.f32.mrb[24].mxu1 }
 0x242   : > { %v1215_v29 = vpack.c.bf16 %v1202_v27, %v1201_v26  ;;  %v1143_v30 = vadd.f32 %v3046_v28, %v3807_v33  ;;  %v1134_v31 = vpop.f32.mrb[25].mxu1 }
 0x243   : > { %v1135_v32 = vadd.f32 %v3807_v33, %v1134_v31  ;;  %v3047_v34 = vpop.f32.mrb[26].mxu1 }
 0x244   : > { %vm1175_vm9 = vcmp.gt.f32.partialorder %v1143_v30, 0.0  ;;  %v1191_v35 = vmul.f32 0.2, %v1143_v30  ;;  %v1146_v36 = vadd.f32 %v3047_v34, %v3807_v33  ;;  %v1137_v37 = vpop.f32.mrb[27].mxu1  ;;  %3064 = vmatprep.mubr.msk.bf16.mxu1 %vm1260_vm4, %v1215_v29 }
 0x245   : > { %v1189_v38 = vmul.f32 0.2, %v1135_v32  ;;  %v1138_v39 = vadd.f32 %v3807_v33, %v1137_v37  ;;  %3065 = vmatmul.mubr.msk.bf16.gmra.mrb[36].mxu1 %vm1260_vm4, %v1216_v8  ;;  %vm1173_vm10 = vcmp.gt.f32.partialorder %v1135_v32, 0.0 }
 0x246   : > { %v1207_v40 = vsel %vm1175_vm9, %v1143_v30, %v1191_v35  ;;  %vm1176_vm11 = vcmp.gt.f32.partialorder %v1146_v36, 0.0  ;;  %v1192_v41 = vmul.f32 0.2, %v1146_v36 }
 0x247   : > { %vm1174_vm12 = vcmp.gt.f32.partialorder %v1138_v39, 0.0  ;;  %v1190_v42 = vmul.f32 0.2, %v1138_v39  ;;  %v1205_v45 = vsel %vm1173_vm10, %v1135_v32, %v1189_v38 }
 0x248   : > { %v1208_v44 = vsel %vm1176_vm11, %v1146_v36, %v1192_v41 }
 0x249   : > { %v1218_v46 = vpack.c.bf16 %v1208_v44, %v1207_v40  ;;  %v1206_v48 = vsel %vm1174_vm12, %v1138_v39, %v1190_v42  ;;  %v3050_v49 = vpop.f32.mrb[28].mxu1 }
 0x24a   : > { %v1217_v50 = vpack.c.bf16 %v1206_v48, %v1205_v45  ;;  %v1159_v51 = vadd.f32 %v3050_v49, %v3807_v33  ;;  %v1150_v52 = vpop.f32.mrb[29].mxu1 }
 0x24b   : > { %v1151_v53 = vadd.f32 %v3807_v33, %v1150_v52  ;;  %v3051_v54 = vpop.f32.mrb[30].mxu1 }
 0x24c   : > { %vm1179_vm13 = vcmp.gt.f32.partialorder %v1159_v51, 0.0  ;;  %v1195_v55 = vmul.f32 0.2, %v1159_v51  ;;  %v1162_v10 = vadd.f32 %v3051_v54, %v3807_v33  ;;  %v1153_v56 = vpop.f32.mrb[31].mxu1  ;;  %3068 = vmatprep.mubr.msk.bf16.mxu1 %vm1260_vm4, %v1217_v50 }
 0x24d   : > { %vm1177_vm14 = vcmp.gt.f32.partialorder %v1151_v53, 0.0  ;;  %v1193_v57 = vmul.f32 0.2, %v1151_v53  ;;  %v1154_v43 = vadd.f32 %v3807_v33, %v1153_v56  ;;  %3069 = vmatmul.mubr.msk.bf16.gmra.mrb[40].mxu1 %vm1260_vm4, %v1218_v46  ;;  %v3836_v33 = vld [vmem:[%s4341_s6] ss:$0 sm:$0xff] }
 0x24e   : > { %v1211_v47 = vsel %vm1179_vm13, %v1159_v51, %v1195_v55  ;;  %vm1180_vm15 = vcmp.gt.f32.partialorder %v1162_v10, 0.0  ;;  %v1196_v58 = vmul.f32 0.2, %v1162_v10 }
 0x24f   : > { %v1209_v59 = vsel %vm1177_vm14, %v1151_v53, %v1193_v57  ;;  %vm1178_vm0 = vcmp.gt.f32.partialorder %v1154_v43, 0.0  ;;  %v1194_v60 = vmul.f32 0.2, %v1154_v43 }
 0x250   : > { %v1212_v61 = vsel %vm1180_vm15, %v1162_v10, %v1196_v58 }
 0x251   : > { %v1220_v62 = vpack.c.bf16 %v1212_v61, %v1211_v47  ;;  %v1210_v63 = vsel %vm1178_vm0, %v1154_v43, %v1194_v60 }
 0x252   : > { %v1219_v0 = vpack.c.bf16 %v1210_v63, %v1209_v59 }
 0x254   : > { %3072 = vmatprep.mubr.msk.bf16.mxu1 %vm1260_vm4, %v1219_v0 }
 0x255   : > { %3073 = vmatmul.mubr.msk.bf16.gmra.mrb[44].mxu1 %vm1260_vm4, %v1220_v62 }
 0x308   : > { %v3062_v1 = vpop.f32.mrb[32].mxu1 }
 0x309   : > { %v1328_v2 = vadd.f32 %v3062_v1, %v3836_v33  ;;  %v1319_v3 = vpop.f32.mrb[33].mxu1 }
 0x30a   : > { %v1320_v4 = vadd.f32 %v3836_v33, %v1319_v3  ;;  %v3063_v5 = vpop.f32.mrb[34].mxu1 }
 0x30b   : > { %v1400_v6 = vmul.f32 0.2, %v1328_v2  ;;  %v1331_v7 = vadd.f32 %v3063_v5, %v3836_v33  ;;  %v1322_v9 = vpop.f32.mrb[35].mxu1  ;;  %vm1384_vm1 = vcmp.gt.f32.partialorder %v1328_v2, 0.0 }
 0x30c   : > { %v1398_v11 = vmul.f32 0.2, %v1320_v4  ;;  %v1323_v12 = vadd.f32 %v3836_v33, %v1322_v9  ;;  %vm1382_vm2 = vcmp.gt.f32.partialorder %v1320_v4, 0.0 }
 0x30d   : > { %vm1385_vm3 = vcmp.gt.f32.partialorder %v1331_v7, 0.0  ;;  %v1401_v13 = vmul.f32 0.2, %v1331_v7  ;;  %v1416_v15 = vsel %vm1384_vm1, %v1328_v2, %v1400_v6 }
 0x30e   : > { %vm1383_vm5 = vcmp.gt.f32.partialorder %v1323_v12, 0.0  ;;  %v1399_v14 = vmul.f32 0.2, %v1323_v12  ;;  %v1414_v17 = vsel %vm1382_vm2, %v1320_v4, %v1398_v11 }
 0x30f   : > { %v1417_v16 = vsel %vm1385_vm3, %v1331_v7, %v1401_v13  ;;  %vm1766_vm3 = vcmask 130048  }
 0x310   : > { %v1431_v18 = vpack.c.bf16 %v1417_v16, %v1416_v15  ;;  %v1415_v19 = vsel %vm1383_vm5, %v1323_v12, %v1399_v14  ;;  %v3872_v12 = vld [vmem:[%s4343_s8] ss:$0 sm:$0xff] }
 0x311   : > { %v1430_v20 = vpack.c.bf16 %v1415_v19, %v1414_v17 }
 0x313   : > { %3080 = vmatprep.mubr.msk.bf16.mxu0 %vm1461_vm6, %v1430_v20 }
 0x314   : > { %3081 = vmatmul.mubr.msk.bf16.vlgmr.msra.gmra.mrb[16].mxu0 %vm1461_vm6, %v1431_v18 }
 0x318   : > { %v3066_v21 = vpop.f32.mrb[36].mxu1 }
 0x319   : > { %v1344_v22 = vadd.f32 %v3066_v21, %v3836_v33  ;;  %v1335_v23 = vpop.f32.mrb[37].mxu1 }
 0x31a   : > { %v1336_v24 = vadd.f32 %v3836_v33, %v1335_v23  ;;  %v3067_v25 = vpop.f32.mrb[38].mxu1 }
 0x31b   : > { %v1404_v26 = vmul.f32 0.2, %v1344_v22  ;;  %v1347_v8 = vadd.f32 %v3067_v25, %v3836_v33  ;;  %v1338_v27 = vpop.f32.mrb[39].mxu1  ;;  %vm1388_vm7 = vcmp.gt.f32.partialorder %v1344_v22, 0.0 }
 0x31c   : > { %v1402_v28 = vmul.f32 0.2, %v1336_v24  ;;  %v1339_v29 = vadd.f32 %v3836_v33, %v1338_v27  ;;  %vm1386_vm8 = vcmp.gt.f32.partialorder %v1336_v24, 0.0 }
 0x31d   : > { %vm1389_vm9 = vcmp.gt.f32.partialorder %v1347_v8, 0.0  ;;  %v1405_v30 = vmul.f32 0.2, %v1347_v8  ;;  %v1420_v32 = vsel %vm1388_vm7, %v1344_v22, %v1404_v26 }
 0x31e   : > { %vm1387_vm10 = vcmp.gt.f32.partialorder %v1339_v29, 0.0  ;;  %v1403_v31 = vmul.f32 0.2, %v1339_v29  ;;  %v1418_v35 = vsel %vm1386_vm8, %v1336_v24, %v1402_v28 }
 0x31f   : > { %v1421_v34 = vsel %vm1389_vm9, %v1347_v8, %v1405_v30 }
 0x320   : > { %v1433_v36 = vpack.c.bf16 %v1421_v34, %v1420_v32  ;;  %v1419_v37 = vsel %vm1387_vm10, %v1339_v29, %v1403_v31  ;;  %v3070_v38 = vpop.f32.mrb[40].mxu1 }
 0x321   : > { %v1432_v39 = vpack.c.bf16 %v1419_v37, %v1418_v35  ;;  %v1360_v40 = vadd.f32 %v3070_v38, %v3836_v33  ;;  %v1351_v41 = vpop.f32.mrb[41].mxu1 }
 0x322   : > { %v1352_v42 = vadd.f32 %v3836_v33, %v1351_v41  ;;  %v3071_v44 = vpop.f32.mrb[42].mxu1 }
 0x323   : > { %v1408_v45 = vmul.f32 0.2, %v1360_v40  ;;  %v1363_v46 = vadd.f32 %v3071_v44, %v3836_v33  ;;  %v1354_v48 = vpop.f32.mrb[43].mxu1  ;;  %3084 = vmatprep.mubr.msk.bf16.mxu0 %vm1461_vm6, %v1432_v39  ;;  %vm1392_vm11 = vcmp.gt.f32.partialorder %v1360_v40, 0.0 }
 0x324   : > { %v1406_v49 = vmul.f32 0.2, %v1352_v42  ;;  %v1355_v50 = vadd.f32 %v3836_v33, %v1354_v48  ;;  %3085 = vmatmul.mubr.msk.bf16.gmra.mrb[20].mxu0 %vm1461_vm6, %v1433_v36  ;;  %vm1390_vm12 = vcmp.gt.f32.partialorder %v1352_v42, 0.0 }
 0x325   : > { %vm1393_vm13 = vcmp.gt.f32.partialorder %v1363_v46, 0.0  ;;  %v1409_v51 = vmul.f32 0.2, %v1363_v46  ;;  %v1424_v53 = vsel %vm1392_vm11, %v1360_v40, %v1408_v45 }
 0x326   : > { %vm1391_vm14 = vcmp.gt.f32.partialorder %v1355_v50, 0.0  ;;  %v1407_v52 = vmul.f32 0.2, %v1355_v50  ;;  %v1422_v55 = vsel %vm1390_vm12, %v1352_v42, %v1406_v49 }
 0x327   : > { %v1425_v54 = vsel %vm1393_vm13, %v1363_v46, %v1409_v51 }
 0x328   : > { %v1435_v10 = vpack.c.bf16 %v1425_v54, %v1424_v53  ;;  %v1423_v56 = vsel %vm1391_vm14, %v1355_v50, %v1407_v52  ;;  %v3074_v57 = vpop.f32.mrb[44].mxu1 }
 0x329   : > { %v1434_v43 = vpack.c.bf16 %v1423_v56, %v1422_v55  ;;  %v1376_v47 = vadd.f32 %v3074_v57, %v3836_v33  ;;  %v1367_v58 = vpop.f32.mrb[45].mxu1 }
 0x32a   : > { %v1368_v59 = vadd.f32 %v3836_v33, %v1367_v58  ;;  %v3075_v60 = vpop.f32.mrb[46].mxu1 }
 0x32b   : > { %vm1396_vm15 = vcmp.gt.f32.partialorder %v1376_v47, 0.0  ;;  %v1412_v61 = vmul.f32 0.2, %v1376_v47  ;;  %v1379_v62 = vadd.f32 %v3075_v60, %v3836_v33  ;;  %v1370_v63 = vpop.f32.mrb[47].mxu1  ;;  %3088 = vmatprep.mubr.msk.bf16.mxu0 %vm1461_vm6, %v1434_v43 }
 0x32c   : > { %vm1394_vm0 = vcmp.gt.f32.partialorder %v1368_v59, 0.0  ;;  %v1410_v0 = vmul.f32 0.2, %v1368_v59  ;;  %v1371_v1 = vadd.f32 %v3836_v33, %v1370_v63  ;;  %3089 = vmatmul.mubr.msk.bf16.gmra.mrb[24].mxu0 %vm1461_vm6, %v1435_v10  ;;  %v3256_v33 = vld [vmem:[%s4344_s9] sm:$0xff]  }
 0x32d   : > { %v1428_v2 = vsel %vm1396_vm15, %v1376_v47, %v1412_v61  ;;  %vm1397_vm1 = vcmp.gt.f32.partialorder %v1379_v62, 0.0  ;;  %v1413_v3 = vmul.f32 0.2, %v1379_v62  ;;  %3096 = vmatprep.subr.bf16.mxu1 %v3256_v33 }
 0x32e   : > { %v1426_v4 = vsel %vm1394_vm0, %v1368_v59, %v1410_v0  ;;  %vm1395_vm2 = vcmp.gt.f32.partialorder %v1371_v1, 0.0  ;;  %v1411_v5 = vmul.f32 0.2, %v1371_v1  ;;  %3097 = vmatpush3.bf16.msra.mxu1 %v3256_v33 }
 0x32f   : > { %v1429_v6 = vsel %vm1397_vm1, %v1379_v62, %v1413_v3 }
 0x330   : > { %v1437_v7 = vpack.c.bf16 %v1429_v6, %v1428_v2  ;;  %v1427_v9 = vsel %vm1395_vm2, %v1371_v1, %v1411_v5 }
 0x331   : > { %v1436_v11 = vpack.c.bf16 %v1427_v9, %v1426_v4 }
 0x333   : > { %3092 = vmatprep.mubr.msk.bf16.mxu0 %vm1461_vm6, %v1436_v11 }
 0x334   : > { %3093 = vmatmul.mubr.msk.bf16.gmra.mrb[28].mxu0 %vm1461_vm6, %v1437_v7 }
 0x3e7   : > { %v3082_v13 = vpop.f32.mrb[16].mxu0 }
 0x3e8   : > { %v3882_v14 = vadd.f32 %v3082_v13, %v3872_v12  ;;  %v1520_v15 = vpop.f32.mrb[17].mxu0 }
 0x3e9   : > { %v3885_v16 = vadd.f32 %v3872_v12, %v1520_v15  ;;  %v3083_v17 = vpop.f32.mrb[18].mxu0 }
 0x3ea   : > { %v1601_v18 = vmul.f32 0.5, %v3882_v14  ;;  %2615 = vst.msk [vmem:[%s3879_s16 + $0x10] sm:$0xff] %vm1461_vm6, %v3882_v14  ;;  %v3892_v19 = vadd.f32 %v3083_v17, %v3872_v12  ;;  %v1523_v20 = vpop.f32.mrb[19].mxu0 }
 0x3eb   : > { %v1599_v21 = vmul.f32 0.5, %v3885_v16  ;;  %2613 = vst.msk [vmem:[%s3879_s16] sm:$0xff] %vm1461_vm6, %v3885_v16  ;;  %v3899_v22 = vadd.f32 %v3872_v12, %v1523_v20 }
 0x3ec   : > { %v1619_v23 = vmul.f32 1.442695, %v1601_v18  ;;  %v1602_v24 = vmul.f32 0.5, %v3892_v19  ;;  %2616 = vst.msk [vmem:[%s3879_s16 + $0x18] sm:$0xff] %vm1461_vm6, %v3892_v19 }
 0x3ed   : > { %v1615_v25 = vmul.f32 1.442695, %v1599_v21  ;;  %v1600_v26 = vmul.f32 0.5, %v3899_v22  ;;  %2614 = vst.msk [vmem:[%s3879_s16 + $0x8] sm:$0xff] %vm1461_vm6, %v3899_v22 }
 0x3ee   : > { %3287 = vpow2.f32 %v1619_v23  ;;  %v1621_v8 = vmul.f32 1.442695, %v1602_v24 }
 0x3ef   : > { %3289 = vpow2.f32 %v1615_v25  ;;  %v1617_v27 = vmul.f32 1.442695, %v1600_v26 }
 0x3f0   : > { %3291 = vpow2.f32 %v1621_v8 }
 0x3f1   : > { %3293 = vpow2.f32 %v1617_v27 }
 0x3f7   : > { %v3086_v28 = vpop.f32.mrb[20].mxu0 }
 0x3f8   : > { %v3288_v29 = vpop.eup %3287  ;;  %v3910_v30 = vadd.f32 %v3086_v28, %v3872_v12  ;;  %v1536_v31 = vpop.f32.mrb[21].mxu0 }
 0x3f9   : > { %v3290_v32 = vpop.eup %3289  ;;  %v3913_v34 = vadd.f32 %v3872_v12, %v1536_v31  ;;  %1667 = vrot.lane.b32.xlu1 %v3288_v29, %s3420_s20  ;;  %v3087_v35 = vpop.f32.mrb[22].mxu0  ;;  %v3257_v29 = vld [vmem:[%s4346_s11] sm:$0xff]   ;;  %v3258_v31 = vld [vmem:[%s4346_s11 + $0x8] sm:$0xff]  }
 0x3fa   : > { %2619 = vst.msk [vmem:[%s3879_s16 + $0x30] sm:$0xff] %vm1461_vm6, %v3910_v30  ;;  %v3920_v36 = vadd.f32 %v3087_v35, %v3872_v12  ;;  %v1539_v37 = vpop.f32.mrb[23].mxu0  ;;  %1663 = vrot.lane.b32.xlu0 %v3290_v32, %s3420_s20  ;;  %v1605_v38 = vmul.f32 0.5, %v3910_v30  ;;  %v3292_v41 = vpop.eup %3291  ;;  %3114 = vmatprep.subr.bf16.mxu0 %v3257_v29 }
 0x3fb   : > { %v1603_v39 = vmul.f32 0.5, %v3913_v34  ;;  %2617 = vst.msk [vmem:[%s3879_s16 + $0x20] sm:$0xff] %vm1461_vm6, %v3913_v34  ;;  %v3929_v40 = vadd.f32 %v3872_v12, %v1539_v37  ;;  %v3294_v42 = vpop.eup %3293  ;;  %3115 = vmatpush3.bf16.msra.mxu0 %v3257_v29 }
 0x3fc   : > { %2620 = vst.msk [vmem:[%s3879_s16 + $0x38] sm:$0xff] %vm1461_vm6, %v3920_v36  ;;  %v1606_v45 = vmul.f32 0.5, %v3920_v36  ;;  %v1627_v48 = vmul.f32 1.442695, %v1605_v38  ;;  %3116 = vmatprep.subr.bf16.mxu0 %v3258_v31 }
 0x3fd   : > { %v1623_v44 = vmul.f32 1.442695, %v1603_v39  ;;  %v1604_v46 = vmul.f32 0.5, %v3929_v40  ;;  %2618 = vst.msk [vmem:[%s3879_s16 + $0x28] sm:$0xff] %vm1461_vm6, %v3929_v40  ;;  %1669 = vrot.lane.b32.xlu1 %v3292_v41, %s3420_s20  ;;  %v1583_v39 = vld [vmem:[%s4020_s14] sm:$0xff] }
 0x3fe   : > { %1665 = vrot.lane.b32.xlu0 %v3294_v42, %s3420_s20  ;;  %v1629_v53 = vmul.f32 1.442695, %v1606_v45  ;;  %v1585_v42 = vld [vmem:[%s4020_s14 + $0x10] sm:$0xff]  ;;  %v1584_v45 = vld [vmem:[%s4020_s14 + $0x8] sm:$0xff] }
 0x3ff   : > { %3295 = vpow2.f32 %v1623_v44  ;;  %v1625_v49 = vmul.f32 1.442695, %v1604_v46  ;;  %v3090_v50 = vpop.f32.mrb[24].mxu0  ;;  %3117 = vmatpush3.bf16.msra.mxu0 %v3258_v31  ;;  %v1586_v44 = vld [vmem:[%s4020_s14 + $0x18] sm:$0xff] }
 0x400   : > { %v3942_v51 = vadd.f32 %v3090_v50, %v3872_v12  ;;  %v1552_v52 = vpop.f32.mrb[25].mxu0 }
 0x401   : > { %3297 = vpow2.f32 %v1625_v49  ;;  %v3945_v54 = vadd.f32 %v3872_v12, %v1552_v52  ;;  %v3091_v55 = vpop.f32.mrb[26].mxu0 }
 0x402   : > { %2623 = vst.msk [vmem:[%s3879_s16 + $0x50] sm:$0xff] %vm1461_vm6, %v3942_v51  ;;  %v3951_v10 = vadd.f32 %v3091_v55, %v3872_v12  ;;  %v1555_v56 = vpop.f32.mrb[27].mxu0  ;;  %3299 = vpow2.f32 %v1627_v48  ;;  %v1609_v57 = vmul.f32 0.5, %v3942_v51 }
 0x403   : > { %v1607_v43 = vmul.f32 0.5, %v3945_v54  ;;  %2621 = vst.msk [vmem:[%s3879_s16 + $0x40] sm:$0xff] %vm1461_vm6, %v3945_v54  ;;  %v3959_v47 = vadd.f32 %v3872_v12, %v1555_v56  ;;  %3301 = vpow2.f32 %v1629_v53 }
 0x404   : > { %2624 = vst.msk [vmem:[%s3879_s16 + $0x58] sm:$0xff] %vm1461_vm6, %v3951_v10  ;;  %v1610_v59 = vmul.f32 0.5, %v3951_v10  ;;  %v1635_v61 = vmul.f32 1.442695, %v1609_v57 }
 0x405   : > { %v1631_v58 = vmul.f32 1.442695, %v1607_v43  ;;  %v1608_v60 = vmul.f32 0.5, %v3959_v47  ;;  %2622 = vst.msk [vmem:[%s3879_s16 + $0x48] sm:$0xff] %vm1461_vm6, %v3959_v47 }
 0x406   : > { %v1637_v3 = vmul.f32 1.442695, %v1610_v59 }
 0x407   : > { %3303 = vpow2.f32 %v1631_v58  ;;  %v1633_v62 = vmul.f32 1.442695, %v1608_v60  ;;  %v3094_v63 = vpop.f32.mrb[28].mxu0  ;;  %v1587_v60 = vld [vmem:[%s4020_s14 + $0x20] sm:$0xff] }
 0x408   : > { %v3970_v0 = vadd.f32 %v3094_v63, %v3872_v12  ;;  %v1568_v1 = vpop.f32.mrb[29].mxu0 }
 0x409   : > { %v3296_v2 = vpop.eup %3295  ;;  %3305 = vpow2.f32 %v1633_v62  ;;  %v3973_v4 = vadd.f32 %v3872_v12, %v1568_v1  ;;  %v3095_v5 = vpop.f32.mrb[30].mxu0  ;;  %v1588_v62 = vld [vmem:[%s4020_s14 + $0x28] sm:$0xff] }
 0x40a   : > { %2627 = vst.msk [vmem:[%s3879_s16 + $0x70] sm:$0xff] %vm1461_vm6, %v3970_v0  ;;  %v3979_v6 = vadd.f32 %v3095_v5, %v3872_v12  ;;  %v1571_v7 = vpop.f32.mrb[31].mxu0  ;;  %1671 = vrot.lane.b32.xlu0 %v3296_v2, %s3420_s20  ;;  %3307 = vpow2.f32 %v1635_v61  ;;  %v1613_v11 = vmul.f32 0.5, %v3970_v0 }
 0x40b   : > { %v3298_v9 = vpop.eup %3297  ;;  %v1611_v33 = vmul.f32 0.5, %v3973_v4  ;;  %2625 = vst.msk [vmem:[%s3879_s16 + $0x60] sm:$0xff] %vm1461_vm6, %v3973_v4  ;;  %v3988_v13 = vadd.f32 %v3872_v12, %v1571_v7  ;;  %3309 = vpow2.f32 %v1637_v3 }
 0x40c   : > { %2628 = vst.msk [vmem:[%s3879_s16 + $0x78] sm:$0xff] %vm1461_vm6, %v3979_v6  ;;  %1673 = vrot.lane.b32.xlu1 %v3298_v9, %s3420_s20  ;;  %v3300_v15 = vpop.eup %3299  ;;  %v1614_v18 = vmul.f32 0.5, %v3979_v6  ;;  %v1643_v12 = vmul.f32 1.442695, %v1613_v11  ;;  %v1591_v9 = vld [vmem:[%s4020_s14 + $0x40] sm:$0xff] }
 0x40d   : > { %v1639_v17 = vmul.f32 1.442695, %v1611_v33  ;;  %v1612_v20 = vmul.f32 0.5, %v3988_v13  ;;  %2626 = vst.msk [vmem:[%s3879_s16 + $0x68] sm:$0xff] %vm1461_vm6, %v3988_v13  ;;  %v3302_v21 = vpop.eup %3301  ;;  %s4394_s16 = sld [smem:[#allocation18_spill]] }
 0x40e   : > { %1675 = vrot.lane.b32.xlu0 %v3300_v15, %s3420_s20  ;;  %v1645_v25 = vmul.f32 1.442695, %v1614_v18 }
 0x40f   : > { %3311 = vpow2.f32 %v1639_v17  ;;  %v1641_v23 = vmul.f32 1.442695, %v1612_v20  ;;  %v1592_v17 = vld [vmem:[%s4020_s14 + $0x48] sm:$0xff] }
 0x410   : > { %1677 = vrot.lane.b32.xlu1 %v3302_v21, %s3420_s20 }
 0x411   : > { %v3304_v24 = vpop.eup %3303  ;;  %3313 = vpow2.f32 %v1641_v23 }
 0x412   : > { %1679 = vrot.lane.b32.xlu0 %v3304_v24, %s3420_s20  ;;  %3315 = vpow2.f32 %v1643_v12  ;;  %v1593_v12 = vld [vmem:[%s4020_s14 + $0x50] sm:$0xff] }
 0x413   : > { %v3306_v26 = vpop.eup %3305  ;;  %3317 = vpow2.f32 %v1645_v25  ;;  %v1594_v25 = vld [vmem:[%s4020_s14 + $0x58] sm:$0xff] }
 0x414   : > { %1681 = vrot.lane.b32.xlu1 %v3306_v26, %s3420_s20  ;;  %v3308_v8 = vpop.eup %3307 }
 0x415   : > { %v3310_v27 = vpop.eup %3309 }
 0x416   : > { %1683 = vrot.lane.b32.xlu0 %v3308_v8, %s3420_s20 }
 0x418   : > { %1685 = vrot.lane.b32.xlu1 %v3310_v27, %s3420_s20 }
 0x419   : > { %v3312_v28 = vpop.eup %3311 }
 0x41a   : > { %1687 = vrot.lane.b32.xlu0 %v3312_v28, %s3420_s20 }
 0x41b   : > { %v3314_v32 = vpop.eup %3313 }
 0x41c   : > { %1689 = vrot.lane.b32.xlu1 %v3314_v32, %s3420_s20  ;;  %v3316_v35 = vpop.eup %3315  ;;  %v1596_v32 = vld [vmem:[%s4020_s14 + $0x68] sm:$0xff] }
 0x41d   : > { %v3318_v37 = vpop.eup %3317 }
 0x41e   : > { %1691 = vrot.lane.b32.xlu0 %v3316_v35, %s3420_s20 }
 0x420   : > { %1693 = vrot.lane.b32.xlu1 %v3318_v37, %s3420_s20 }
 0x46b   : > { %v1668_v38 = vpop.permute.xlu1 %1667 }
 0x46c   : > { %v1664_v41 = vpop.permute.xlu0 %1663  ;;  %v1713_v49 = vmul.f32 %v1668_v38, %v1585_v42 }
 0x46d   : > { %v1711_v46 = vmul.f32 %v1664_v41, %v1583_v39  ;;  %v1597_v39 = vld [vmem:[%s4020_s14 + $0x70] sm:$0xff] }
 0x46e   : > { %v1729_v43 = vadd.f32 %v1713_v49, %v3882_v14 }
 0x46f   : > { %v1670_v48 = vpop.permute.xlu1 %1669  ;;  %v1727_v56 = vadd.f32 %v1711_v46, %v3885_v16  ;;  %v1589_v16 = vld [vmem:[%s4020_s14 + $0x30] sm:$0xff] }
 0x470   : > { %v1714_v50 = vmul.f32 %v1670_v48, %v1586_v44  ;;  %v1666_v52 = vpop.permute.xlu0 %1665  ;;  %v1598_v44 = vld [vmem:[%s4020_s14 + $0x78] sm:$0xff] }
 0x471   : > { %v1712_v53 = vmul.f32 %v1666_v52, %v1584_v45 }
 0x472   : > { %v1730_v55 = vadd.f32 %v1714_v50, %v3892_v19 }
 0x473   : > { %v1728_v57 = vadd.f32 %v1712_v53, %v3899_v22  ;;  %v1590_v22 = vld [vmem:[%s4020_s14 + $0x38] sm:$0xff] }
 0x474   : > { %v1744_v59 = vpack.c.bf16 %v1730_v55, %v1729_v43 }
 0x475   : > { %v1743_v58 = vpack.c.bf16 %v1728_v57, %v1727_v56 }
 0x477   : > { %3098 = vmatprep.mubr.msk.bf16.mxu1 %vm1766_vm3, %v1743_v58 }
 0x478   : > { %3099 = vmatmul.mubr.msk.bf16.vlgmr.msra.gmra.mrb[48].mxu1 %vm1766_vm3, %v1744_v59 }
 0x47c   : > { %v1672_v61 = vpop.permute.xlu0 %1671 }
 0x47d   : > { %v1715_v19 = vmul.f32 %v1672_v61, %v1587_v60 }
 0x47e   : > { %v1674_v63 = vpop.permute.xlu1 %1673 }
 0x47f   : > { %v1716_v1 = vmul.f32 %v1674_v63, %v1588_v62  ;;  %v1731_v14 = vadd.f32 %v1715_v19, %v3913_v34 }
 0x480   : > { %v1676_v2 = vpop.permute.xlu0 %1675 }
 0x481   : > { %v1732_v3 = vadd.f32 %v1716_v1, %v3929_v40  ;;  %v1717_v5 = vmul.f32 %v1676_v2, %v1589_v16 }
 0x482   : > { %v1678_v7 = vpop.permute.xlu1 %1677 }
 0x483   : > { %v1745_v11 = vpack.c.bf16 %v1732_v3, %v1731_v14  ;;  %v1718_v33 = vmul.f32 %v1678_v7, %v1590_v22  ;;  %v1733_v18 = vadd.f32 %v1717_v5, %v3910_v30 }
 0x484   : > { %v1680_v15 = vpop.permute.xlu0 %1679 }
 0x485   : > { %v1734_v20 = vadd.f32 %v1718_v33, %v3920_v36  ;;  %v1719_v21 = vmul.f32 %v1680_v15, %v1591_v9  ;;  %3102 = vmatprep.mubr.msk.bf16.mxu1 %vm1766_vm3, %v1745_v11  ;;  %v1595_v36 = vld [vmem:[%s4020_s14 + $0x60] sm:$0xff]  ;;  %s4397_s14 = sld [smem:[#allocation12_spill]] }
 0x486   : > { %v1682_v34 = vpop.permute.xlu1 %1681 }
 0x487   : > { %v1746_v40 = vpack.c.bf16 %v1734_v20, %v1733_v18  ;;  %v1720_v23 = vmul.f32 %v1682_v34, %v1592_v17  ;;  %v1735_v26 = vadd.f32 %v1719_v21, %v3945_v54 }
 0x488   : > { %v1684_v24 = vpop.permute.xlu0 %1683 }
 0x489   : > { %v1736_v8 = vadd.f32 %v1720_v23, %v3959_v47  ;;  %v1721_v27 = vmul.f32 %v1684_v24, %v1593_v12  ;;  %3103 = vmatmul.mubr.msk.bf16.gmra.mrb[52].mxu1 %vm1766_vm3, %v1746_v40 }
 0x48a   : > { %v1686_v30 = vpop.permute.xlu1 %1685 }
 0x48b   : > { %v1747_v28 = vpack.c.bf16 %v1736_v8, %v1735_v26  ;;  %v1722_v29 = vmul.f32 %v1686_v30, %v1594_v25  ;;  %v1737_v35 = vadd.f32 %v1721_v27, %v3942_v51  ;;  %p4399_p12 = scmp.ne.s32.totalorder %s4397_s14, 0 }
 0x48c   : > { %v1688_v31 = vpop.permute.xlu0 %1687 }
 0x48d   : > { %v1738_v37 = vadd.f32 %v1722_v29, %v3951_v10  ;;  %v1723_v38 = vmul.f32 %v1688_v31, %v1595_v36  ;;  %3106 = vmatprep.mubr.msk.bf16.mxu1 %vm1766_vm3, %v1747_v28  ;;  %p3351_p13 = pnand %p3350_p11, %p4399_p12 }
 0x48e   : > { %v1690_v54 = vpop.permute.xlu1 %1689 }
 0x48f   : > { %v1748_v47 = vpack.c.bf16 %v1738_v37, %v1737_v35  ;;  %v1724_v41 = vmul.f32 %v1690_v54, %v1596_v32  ;;  %v1739_v45 = vadd.f32 %v1723_v38, %v3973_v4  ;;  %v3259_v4 = vld [vmem:[%s4348_s13] sm:$0xff]   ;;  %p3352_p8 = pneg %p3351_p13 }
 0x490   : > { %v1692_v42 = vpop.permute.xlu0 %1691  ;;  %3134 = vmatprep.subr.bf16.mxu1 %v3259_v4 }
 0x491   : > { %v1740_v46 = vadd.f32 %v1724_v41, %v3988_v13  ;;  %v1725_v48 = vmul.f32 %v1692_v42, %v1597_v39  ;;  %3107 = vmatmul.mubr.msk.bf16.gmra.mrb[56].mxu1 %vm1766_vm3, %v1748_v47  ;;  %v3260_v13 = vld [vmem:[%s4348_s13 + $0x8] sm:$0xff]  }
 0x492   : > { %v1694_v49 = vpop.permute.xlu1 %1693  ;;  %3135 = vmatpush3.bf16.msra.mxu1 %v3259_v4 }
 0x493   : > { %v1749_v51 = vpack.c.bf16 %v1740_v46, %v1739_v45  ;;  %v1726_v50 = vmul.f32 %v1694_v49, %v1598_v44  ;;  %v1741_v10 = vadd.f32 %v1725_v48, %v3970_v0  ;;  %3136 = vmatprep.subr.bf16.mxu1 %v3260_v13  ;;  %v3261_v0 = vld [vmem:[%s4348_s13 + $0x10] sm:$0xff]  }
 0x495   : > { %v1742_v52 = vadd.f32 %v1726_v50, %v3979_v6  ;;  %3110 = vmatprep.mubr.msk.bf16.mxu1 %vm1766_vm3, %v1749_v51  ;;  %v4074_v6 = vld [vmem:[%s4345_s10] ss:$0 sm:$0xff] }
 0x496   : > { %3137 = vmatpush3.bf16.msra.mxu1 %v3260_v13 }
 0x497   : > { %v1750_v53 = vpack.c.bf16 %v1742_v52, %v1741_v10  ;;  %3138 = vmatprep.subr.bf16.mxu1 %v3261_v0 }
 0x499   : > { %3111 = vmatmul.mubr.msk.bf16.gmra.mrb[60].mxu1 %vm1766_vm3, %v1750_v53 }
 0x49a   : > { %3139 = vmatpush3.bf16.msra.mxu1 %v3261_v0 }
 0x54b   : > { %v3100_v55 = vpop.f32.mrb[48].mxu1 }
 0x54c   : > { %v1834_v56 = vadd.f32 %v3100_v55, %v4074_v6  ;;  %v1825_v57 = vpop.f32.mrb[49].mxu1 }
 0x54d   : > { %v1826_v43 = vadd.f32 %v4074_v6, %v1825_v57  ;;  %v3101_v58 = vpop.f32.mrb[50].mxu1 }
 0x54e   : > { %v1906_v59 = vmul.f32 0.2, %v1834_v56  ;;  %v1837_v60 = vadd.f32 %v3101_v58, %v4074_v6  ;;  %v1828_v61 = vpop.f32.mrb[51].mxu1  ;;  %vm1890_vm5 = vcmp.gt.f32.partialorder %v1834_v56, 0.0 }
 0x54f   : > { %v1904_v62 = vmul.f32 0.2, %v1826_v43  ;;  %v1829_v19 = vadd.f32 %v4074_v6, %v1828_v61  ;;  %vm1888_vm7 = vcmp.gt.f32.partialorder %v1826_v43, 0.0 }
 0x550   : > { %vm1891_vm8 = vcmp.gt.f32.partialorder %v1837_v60, 0.0  ;;  %v1907_v63 = vmul.f32 0.2, %v1837_v60  ;;  %v1922_v1 = vsel %vm1890_vm5, %v1834_v56, %v1906_v59 }
 0x551   : > { %vm1889_vm9 = vcmp.gt.f32.partialorder %v1829_v19, 0.0  ;;  %v1905_v16 = vmul.f32 0.2, %v1829_v19  ;;  %v1920_v22 = vsel %vm1888_vm7, %v1826_v43, %v1904_v62 }
 0x552   : > { %v1923_v2 = vsel %vm1891_vm8, %v1837_v60, %v1907_v63  ;;  %v3265_v63 = vld [vmem:[%s4350_s15 + $0x4] ss:$8 sps:$4 sm:$0xff]  }
 0x553   : > { %v1937_v14 = vpack.c.bf16 %v1923_v2, %v1922_v1  ;;  %v1921_v3 = vsel %vm1889_vm9, %v1829_v19, %v1905_v16  ;;  %v3263_v19 = vld [vmem:[%s4350_s15] ss:$8 sps:$4 sm:$0xff]   ;;  %v3268_v16 = vld [vmem:[%s4350_s15 + $0x14] ss:$8 sps:$4 sm:$0xff]   ;;  %2468 = vmatprep.subr.bf16.mxu0 %v3265_v63  ;;  %v3266_v1 = vld [vmem:[%s4350_s15 + $0x10] ss:$8 sps:$4 sm:$0xff]  }
 0x554   : > { %v1936_v5 = vpack.c.bf16 %v1921_v3, %v1920_v22  ;;  %v3271_v2 = vld [vmem:[%s4350_s15 + $0x24] ss:$8 sps:$4 sm:$0xff]   ;;  %v3269_v22 = vld [vmem:[%s4350_s15 + $0x20] ss:$8 sps:$4 sm:$0xff]   ;;  %v3272_v3 = vld [vmem:[%s4350_s15 + $0x30] ss:$8 sps:$4 sm:$0xff]  }
 0x556   : > { %3118 = vmatprep.mubr.msk.bf16.mxu0 %vm1461_vm6, %v1936_v5  ;;  %v3277_v5 = vld [vmem:[%s4350_s15 + $0x44] ss:$8 sps:$4 sm:$0xff]  }
 0x557   : > { %3119 = vmatmul.mubr.msk.bf16.vlgmr.msra.gmra.mrb[32].mxu0 %vm1461_vm6, %v1937_v14  ;;  %v3274_v14 = vld [vmem:[%s4350_s15 + $0x34] ss:$8 sps:$4 sm:$0xff]  }
 0x558   : > { %2469 = vmatpush1.bf16.msra.mxu0 %v3263_v19 }
 0x559   : > { %2470 = vmatprep.subr.bf16.mxu0 %v3268_v16 }
 0x55c   : > { %v3104_v7 = vpop.f32.mrb[52].mxu1  ;;  %2471 = vmatpush1.bf16.msra.mxu0 %v3266_v1 }
 0x55d   : > { %v1850_v9 = vadd.f32 %v3104_v7, %v4074_v6  ;;  %v1841_v11 = vpop.f32.mrb[53].mxu1  ;;  %2472 = vmatprep.subr.bf16.mxu0 %v3271_v2  ;;  %v3275_v7 = vld [vmem:[%s4350_s15 + $0x40] ss:$8 sps:$4 sm:$0xff]  }
 0x55e   : > { %v1842_v33 = vadd.f32 %v4074_v6, %v1841_v11  ;;  %v3105_v15 = vpop.f32.mrb[54].mxu1  ;;  %v3278_v11 = vld [vmem:[%s4350_s15 + $0x50] ss:$8 sps:$4 sm:$0xff]  }
 0x55f   : > { %v1910_v17 = vmul.f32 0.2, %v1850_v9  ;;  %v1853_v18 = vadd.f32 %v3105_v15, %v4074_v6  ;;  %v1844_v20 = vpop.f32.mrb[55].mxu1  ;;  %vm1894_vm10 = vcmp.gt.f32.partialorder %v1850_v9, 0.0 }
 0x560   : > { %v1908_v21 = vmul.f32 0.2, %v1842_v33  ;;  %v1845_v34 = vadd.f32 %v4074_v6, %v1844_v20  ;;  %vm1892_vm11 = vcmp.gt.f32.partialorder %v1842_v33, 0.0  ;;  %2473 = vmatpush1.bf16.msra.mxu0 %v3269_v22 }
 0x561   : > { %vm1895_vm12 = vcmp.gt.f32.partialorder %v1853_v18, 0.0  ;;  %v1911_v12 = vmul.f32 0.2, %v1853_v18  ;;  %v1926_v23 = vsel %vm1894_vm10, %v1850_v9, %v1910_v17  ;;  %2474 = vmatprep.subr.bf16.mxu0 %v3274_v14  ;;  %v3280_v9 = vld [vmem:[%s4350_s15 + $0x54] ss:$8 sps:$4 sm:$0xff]  }
 0x562   : > { %vm1893_vm13 = vcmp.gt.f32.partialorder %v1845_v34, 0.0  ;;  %v1909_v40 = vmul.f32 0.2, %v1845_v34  ;;  %v1924_v25 = vsel %vm1892_vm11, %v1842_v33, %v1908_v21  ;;  %v4142_v33 = vld [vmem:[%s4347_s12] ss:$0 sm:$0xff] }
 0x563   : > { %v1927_v24 = vsel %vm1895_vm12, %v1853_v18, %v1911_v12 }
 0x564   : > { %v1939_v26 = vpack.c.bf16 %v1927_v24, %v1926_v23  ;;  %v1925_v8 = vsel %vm1893_vm13, %v1845_v34, %v1909_v40  ;;  %v3108_v27 = vpop.f32.mrb[56].mxu1  ;;  %2475 = vmatpush1.bf16.msra.mxu0 %v3272_v3 }
 0x565   : > { %v1938_v30 = vpack.c.bf16 %v1925_v8, %v1924_v25  ;;  %v1866_v36 = vadd.f32 %v3108_v27, %v4074_v6  ;;  %v1857_v28 = vpop.f32.mrb[57].mxu1  ;;  %2476 = vmatprep.subr.bf16.mxu0 %v3277_v5 }
 0x566   : > { %v1858_v29 = vadd.f32 %v4074_v6, %v1857_v28  ;;  %v3109_v31 = vpop.f32.mrb[58].mxu1 }
 0x567   : > { %v1914_v32 = vmul.f32 0.2, %v1866_v36  ;;  %v1869_v35 = vadd.f32 %v3109_v31, %v4074_v6  ;;  %v1860_v37 = vpop.f32.mrb[59].mxu1  ;;  %3122 = vmatprep.mubr.msk.bf16.mxu0 %vm1461_vm6, %v1938_v30  ;;  %vm1898_vm14 = vcmp.gt.f32.partialorder %v1866_v36, 0.0 }
 0x568   : > { %v1912_v38 = vmul.f32 0.2, %v1858_v29  ;;  %v1861_v54 = vadd.f32 %v4074_v6, %v1860_v37  ;;  %3123 = vmatmul.mubr.msk.bf16.gmra.mrb[36].mxu0 %vm1461_vm6, %v1939_v26  ;;  %vm1896_vm15 = vcmp.gt.f32.partialorder %v1858_v29, 0.0 }
 0x569   : > { %vm1899_vm0 = vcmp.gt.f32.partialorder %v1869_v35, 0.0  ;;  %v1915_v39 = vmul.f32 0.2, %v1869_v35  ;;  %v1930_v41 = vsel %vm1898_vm14, %v1866_v36, %v1914_v32  ;;  %2477 = vmatpush1.bf16.msra.mxu0 %v3275_v7 }
 0x56a   : > { %vm1897_vm1 = vcmp.gt.f32.partialorder %v1861_v54, 0.0  ;;  %v1913_v47 = vmul.f32 0.2, %v1861_v54  ;;  %v1928_v44 = vsel %vm1896_vm15, %v1858_v29, %v1912_v38  ;;  %2478 = vmatprep.subr.bf16.mxu0 %v3280_v9 }
 0x56b   : > { %v1931_v42 = vsel %vm1899_vm0, %v1869_v35, %v1915_v39 }
 0x56c   : > { %v1941_v45 = vpack.c.bf16 %v1931_v42, %v1930_v41  ;;  %v1929_v46 = vsel %vm1897_vm1, %v1861_v54, %v1913_v47  ;;  %v3112_v48 = vpop.f32.mrb[60].mxu1 }
 0x56d   : > { %v1940_v49 = vpack.c.bf16 %v1929_v46, %v1928_v44  ;;  %v1882_v51 = vadd.f32 %v3112_v48, %v4074_v6  ;;  %v1873_v50 = vpop.f32.mrb[61].mxu1  ;;  %2479 = vmatpush1.bf16.msra.mxu0 %v3278_v11 }
 0x56e   : > { %v1874_v10 = vadd.f32 %v4074_v6, %v1873_v50  ;;  %v3113_v52 = vpop.f32.mrb[62].mxu1 }
 0x56f   : > { %v1918_v53 = vmul.f32 0.2, %v1882_v51  ;;  %v1885_v4 = vadd.f32 %v3113_v52, %v4074_v6  ;;  %v1876_v13 = vpop.f32.mrb[63].mxu1  ;;  %3126 = vmatprep.mubr.msk.bf16.mxu0 %vm1461_vm6, %v1940_v49  ;;  %vm1902_vm2 = vcmp.gt.f32.partialorder %v1882_v51, 0.0 }
 0x570   : > { %v1916_v0 = vmul.f32 0.2, %v1874_v10  ;;  %v1877_v55 = vadd.f32 %v4074_v6, %v1876_v13  ;;  %3127 = vmatmul.mubr.msk.bf16.gmra.mrb[40].mxu0 %vm1461_vm6, %v1941_v45  ;;  %vm1900_vm3 = vcmp.gt.f32.partialorder %v1874_v10, 0.0  ;;  %v3262_v6 = vld [vmem:[%s4348_s13 + $0x18] sm:$0xff]  }
 0x571   : > { %vm1903_vm5 = vcmp.gt.f32.partialorder %v1885_v4, 0.0  ;;  %v1919_v56 = vmul.f32 0.2, %v1885_v4  ;;  %v1934_v43 = vsel %vm1902_vm2, %v1882_v51, %v1918_v53  ;;  %3140 = vmatprep.subr.bf16.mxu1 %v3262_v6 }
 0x572   : > { %vm1901_vm7 = vcmp.gt.f32.partialorder %v1877_v55, 0.0  ;;  %v1917_v57 = vmul.f32 0.2, %v1877_v55  ;;  %v1932_v59 = vsel %vm1900_vm3, %v1874_v10, %v1916_v0  ;;  %3141 = vmatpush3.bf16.msra.mxu1 %v3262_v6 }
 0x573   : > { %v1935_v58 = vsel %vm1903_vm5, %v1885_v4, %v1919_v56 }
 0x574   : > { %v1943_v60 = vpack.c.bf16 %v1935_v58, %v1934_v43  ;;  %v1933_v61 = vsel %vm1901_vm7, %v1877_v55, %v1917_v57 }
 0x575   : > { %v1942_v62 = vpack.c.bf16 %v1933_v61, %v1932_v59 }
 0x577   : > { %3130 = vmatprep.mubr.msk.bf16.mxu0 %vm1461_vm6, %v1942_v62 }
 0x578   : > { %3131 = vmatmul.mubr.msk.bf16.gmra.mrb[44].mxu0 %vm1461_vm6, %v1943_v60 }
 0x62a   : > { %v3120_v15 = vpop.f32.mrb[32].mxu0 }
 0x62b   : > { %v2034_v17 = vadd.f32 %v3120_v15, %v4142_v33  ;;  %v2025_v18 = vpop.f32.mrb[33].mxu0 }
 0x62c   : > { %v2026_v20 = vadd.f32 %v4142_v33, %v2025_v18  ;;  %v3121_v21 = vpop.f32.mrb[34].mxu0 }
 0x62d   : > { %v2106_v34 = vmul.f32 0.2, %v2034_v17  ;;  %v2037_v12 = vadd.f32 %v3121_v21, %v4142_v33  ;;  %v2028_v40 = vpop.f32.mrb[35].mxu0  ;;  %vm2090_vm6 = vcmp.gt.f32.partialorder %v2034_v17, 0.0 }
 0x62e   : > { %v2104_v23 = vmul.f32 0.2, %v2026_v20  ;;  %v2029_v24 = vadd.f32 %v4142_v33, %v2028_v40  ;;  %vm2088_vm8 = vcmp.gt.f32.partialorder %v2026_v20, 0.0 }
 0x62f   : > { %vm2091_vm9 = vcmp.gt.f32.partialorder %v2037_v12, 0.0  ;;  %v2107_v25 = vmul.f32 0.2, %v2037_v12  ;;  %v2122_v8 = vsel %vm2090_vm6, %v2034_v17, %v2106_v34 }
 0x630   : > { %vm2089_vm10 = vcmp.gt.f32.partialorder %v2029_v24, 0.0  ;;  %v2105_v26 = vmul.f32 0.2, %v2029_v24  ;;  %v2120_v30 = vsel %vm2088_vm8, %v2026_v20, %v2104_v23 }
 0x631   : > { %v2123_v27 = vsel %vm2091_vm9, %v2037_v12, %v2107_v25  ;;  %v3286_v25 = vld [vmem:[%s4350_s15 + $0x74] ss:$8 sps:$4 sm:$0xff]  }
 0x632   : > { %v2137_v36 = vpack.c.bf16 %v2123_v27, %v2122_v8  ;;  %v2121_v28 = vsel %vm2089_vm10, %v2029_v24, %v2105_v26  ;;  %v3281_v24 = vld [vmem:[%s4350_s15 + $0x60] ss:$8 sps:$4 sm:$0xff]   ;;  %v3284_v26 = vld [vmem:[%s4350_s15 + $0x70] ss:$8 sps:$4 sm:$0xff]   ;;  %v3421_v8 = vmov 0  }
 0x633   : > { %v2136_v29 = vpack.c.bf16 %v2121_v28, %v2120_v30  ;;  %2500 = vmatprep.mubr.bf16.mxu0 %v3421_v8  ;;  %v4184_v27 = vld [vmem:[%s4394_s16] ss:$0 sm:$0xff]  ;;  %s4398_s16 = sld [smem:[#allocation20_spill]] }
 0x635   : > { %3142 = vmatprep.mubr.msk.bf16.mxu1 %vm1260_vm4, %v2136_v29 }
 0x636   : > { %3143 = vmatmul.mubr.msk.bf16.vlgmr.msra.gmra.mrb[64].mxu1 %vm1260_vm4, %v2137_v36 }
 0x639   : > { %s4285_s20 = scalar_lea.hbm %s4398_s16, %s2886_s26 }
 0x63b   : > { %v3124_v31 = vpop.f32.mrb[36].mxu0 }
 0x63c   : > { %v2050_v32 = vadd.f32 %v3124_v31, %v4142_v33  ;;  %v2041_v35 = vpop.f32.mrb[37].mxu0 }
 0x63d   : > { %v2042_v37 = vadd.f32 %v4142_v33, %v2041_v35  ;;  %v3125_v38 = vpop.f32.mrb[38].mxu0 }
 0x63e   : > { %v2110_v54 = vmul.f32 0.2, %v2050_v32  ;;  %v2053_v39 = vadd.f32 %v3125_v38, %v4142_v33  ;;  %v2044_v47 = vpop.f32.mrb[39].mxu0  ;;  %vm2094_vm11 = vcmp.gt.f32.partialorder %v2050_v32, 0.0 }
 0x63f   : > { %v2108_v41 = vmul.f32 0.2, %v2042_v37  ;;  %v2045_v42 = vadd.f32 %v4142_v33, %v2044_v47  ;;  %vm2092_vm12 = vcmp.gt.f32.partialorder %v2042_v37, 0.0 }
 0x640   : > { %vm2095_vm13 = vcmp.gt.f32.partialorder %v2053_v39, 0.0  ;;  %v2111_v44 = vmul.f32 0.2, %v2053_v39  ;;  %v2126_v46 = vsel %vm2094_vm11, %v2050_v32, %v2110_v54 }
 0x641   : > { %vm2093_vm14 = vcmp.gt.f32.partialorder %v2045_v42, 0.0  ;;  %v2109_v45 = vmul.f32 0.2, %v2045_v42  ;;  %v2124_v49 = vsel %vm2092_vm12, %v2042_v37, %v2108_v41 }
 0x642   : > { %v2127_v48 = vsel %vm2095_vm13, %v2053_v39, %v2111_v44 }
 0x643   : > { %v2139_v51 = vpack.c.bf16 %v2127_v48, %v2126_v46  ;;  %v2125_v50 = vsel %vm2093_vm14, %v2045_v42, %v2109_v45  ;;  %v3128_v10 = vpop.f32.mrb[40].mxu0 }
 0x644   : > { %v2138_v52 = vpack.c.bf16 %v2125_v50, %v2124_v49  ;;  %v2066_v53 = vadd.f32 %v3128_v10, %v4142_v33  ;;  %v2057_v4 = vpop.f32.mrb[41].mxu0 }
 0x645   : > { %v2058_v13 = vadd.f32 %v4142_v33, %v2057_v4  ;;  %v3129_v0 = vpop.f32.mrb[42].mxu0 }
 0x646   : > { %v2114_v55 = vmul.f32 0.2, %v2066_v53  ;;  %v2069_v56 = vadd.f32 %v3129_v0, %v4142_v33  ;;  %v2060_v57 = vpop.f32.mrb[43].mxu0  ;;  %3146 = vmatprep.mubr.msk.bf16.mxu1 %vm1260_vm4, %v2138_v52  ;;  %vm2098_vm15 = vcmp.gt.f32.partialorder %v2066_v53, 0.0 }
 0x647   : > { %v2112_v43 = vmul.f32 0.2, %v2058_v13  ;;  %v2061_v58 = vadd.f32 %v4142_v33, %v2060_v57  ;;  %3147 = vmatmul.mubr.msk.bf16.gmra.mrb[68].mxu1 %vm1260_vm4, %v2139_v51  ;;  %vm2096_vm0 = vcmp.gt.f32.partialorder %v2058_v13, 0.0 }
 0x648   : > { %vm2099_vm1 = vcmp.gt.f32.partialorder %v2069_v56, 0.0  ;;  %v2115_v59 = vmul.f32 0.2, %v2069_v56  ;;  %v2130_v61 = vsel %vm2098_vm15, %v2066_v53, %v2114_v55 }
 0x649   : > { %vm2097_vm2 = vcmp.gt.f32.partialorder %v2061_v58, 0.0  ;;  %v2113_v60 = vmul.f32 0.2, %v2061_v58  ;;  %v2128_v6 = vsel %vm2096_vm0, %v2058_v13, %v2112_v43 }
 0x64a   : > { %v2131_v62 = vsel %vm2099_vm1, %v2069_v56, %v2115_v59 }
 0x64b   : > { %v2141_v19 = vpack.c.bf16 %v2131_v62, %v2130_v61  ;;  %v2129_v63 = vsel %vm2097_vm2, %v2061_v58, %v2113_v60  ;;  %v3132_v16 = vpop.f32.mrb[44].mxu0 }
 0x64c   : > { %v2140_v1 = vpack.c.bf16 %v2129_v63, %v2128_v6  ;;  %v2082_v2 = vadd.f32 %v3132_v16, %v4142_v33  ;;  %v2073_v22 = vpop.f32.mrb[45].mxu0 }
 0x64d   : > { %v2074_v14 = vadd.f32 %v4142_v33, %v2073_v22  ;;  %v3133_v3 = vpop.f32.mrb[46].mxu0 }
 0x64e   : > { %v2118_v5 = vmul.f32 0.2, %v2082_v2  ;;  %v2085_v7 = vadd.f32 %v3133_v3, %v4142_v33  ;;  %v2076_v9 = vpop.f32.mrb[47].mxu0  ;;  %3150 = vmatprep.mubr.msk.bf16.mxu1 %vm1260_vm4, %v2140_v1  ;;  %vm2102_vm3 = vcmp.gt.f32.partialorder %v2082_v2, 0.0 }
 0x64f   : > { %v2116_v11 = vmul.f32 0.2, %v2074_v14  ;;  %v2077_v15 = vadd.f32 %v4142_v33, %v2076_v9  ;;  %3151 = vmatmul.mubr.msk.bf16.gmra.mrb[72].mxu1 %vm1260_vm4, %v2141_v19  ;;  %vm2100_vm5 = vcmp.gt.f32.partialorder %v2074_v14, 0.0  ;;  %v3283_v33 = vld [vmem:[%s4350_s15 + $0x64] ss:$8 sps:$4 sm:$0xff]  }
 0x650   : > { %vm2103_vm7 = vcmp.gt.f32.partialorder %v2085_v7, 0.0  ;;  %v2119_v17 = vmul.f32 0.2, %v2085_v7  ;;  %v2134_v20 = vsel %vm2102_vm3, %v2082_v2, %v2118_v5  ;;  %2480 = vmatprep.subr.bf16.mxu0 %v3283_v33 }
 0x651   : > { %vm2101_vm6 = vcmp.gt.f32.partialorder %v2077_v15, 0.0  ;;  %v2117_v18 = vmul.f32 0.2, %v2077_v15  ;;  %v2132_v34 = vsel %vm2100_vm5, %v2074_v14, %v2116_v11  ;;  %2481 = vmatpush1.bf16.msra.mxu0 %v3281_v24 }
 0x652   : > { %v2135_v21 = vsel %vm2103_vm7, %v2085_v7, %v2119_v17  ;;  %2482 = vmatprep.subr.bf16.mxu0 %v3286_v25 }
 0x653   : > { %v2143_v12 = vpack.c.bf16 %v2135_v21, %v2134_v20  ;;  %v2133_v40 = vsel %vm2101_vm6, %v2077_v15, %v2117_v18 }
 0x654   : > { %v2142_v23 = vpack.c.bf16 %v2133_v40, %v2132_v34 }
 0x655   : > { %2483 = vmatpush1.bf16.msra.mxu0 %v3284_v26 }
 0x656   : > { %3154 = vmatprep.mubr.msk.bf16.mxu1 %vm1260_vm4, %v2142_v23 }
 0x657   : > { %3155 = vmatmul.mubr.msk.bf16.gmra.mrb[76].mxu1 %vm1260_vm4, %v2143_v12 }
 0x709   : > { %v3144_v30 = vpop.f32.mrb[64].mxu1 }
 0x70a   : > { %v2250_v36 = vadd.f32 %v3144_v30, %v4184_v27  ;;  %v2241_v28 = vpop.f32.mrb[65].mxu1 }
 0x70b   : > { %v2242_v29 = vadd.f32 %v4184_v27, %v2241_v28  ;;  %v3145_v31 = vpop.f32.mrb[66].mxu1 }
 0x70c   : > { %v2322_v32 = vmul.f32 0.2, %v2250_v36  ;;  %v2253_v35 = vadd.f32 %v3145_v31, %v4184_v27  ;;  %v2244_v37 = vpop.f32.mrb[67].mxu1  ;;  %vm2306_vm4 = vcmp.gt.f32.partialorder %v2250_v36, 0.0 }
 0x70d   : > { %v2320_v38 = vmul.f32 0.2, %v2242_v29  ;;  %v2245_v54 = vadd.f32 %v4184_v27, %v2244_v37  ;;  %vm2304_vm8 = vcmp.gt.f32.partialorder %v2242_v29, 0.0 }
 0x70e   : > { %vm2307_vm9 = vcmp.gt.f32.partialorder %v2253_v35, 0.0  ;;  %v2323_v39 = vmul.f32 0.2, %v2253_v35  ;;  %v2338_v41 = vsel %vm2306_vm4, %v2250_v36, %v2322_v32 }
 0x70f   : > { %vm2305_vm10 = vcmp.gt.f32.partialorder %v2245_v54, 0.0  ;;  %v2321_v47 = vmul.f32 0.2, %v2245_v54  ;;  %v2336_v44 = vsel %vm2304_vm8, %v2242_v29, %v2320_v38 }
 0x710   : > { %v2339_v42 = vsel %vm2307_vm9, %v2253_v35, %v2323_v39 }
 0x711   : > { %v2337_v45 = vsel %vm2305_vm10, %v2245_v54, %v2321_v47  ;;  %v2353_v46 = vpack.c.bf16 %v2339_v42, %v2338_v41  ;;  %v2376_v41 = vld [vmem:[%s4395_s0] sm:$0x3]  ;;  %s3422_s0 = smov [#allocation5]  }
 0x712   : > { %v2352_v48 = vpack.c.bf16 %v2337_v45, %v2336_v44  ;;  %s3353_s24 = sshll.u32 %s3422_s0, 4  ;;  %s3354_s24 = int_to_ptr.vmem [resolvable:$false] %s3353_s24 }
 0x713   : > { %s3355_s26 = scalar_lea.vmem %s3354_s24, 8192  ;;  %p3356_p10 = scmp.lt.s32.totalorder %s4287_s29, %s3354_s24 }
 0x714   : > { %2501 = vmatmul.mubr.bf16.vlgmr.msra.gmra.mrb[48].mxu0 %v2352_v48  ;;  %p3357_p0 = scmp.lt.s32.totalorder %s3355_s26, %s3349_s22 }
 0x715   : > { %2510 = vmatprep.mubr.bf16.mxu0 %v3421_v8 }
 0x716   : > { %p3358_p2 = por %p3357_p0, %p3356_p10 }
 0x718   : > { %p3359_p4 = pnand %p3358_p2, %p3352_p8 }
 0x71a   : > { %v3148_v49 = vpop.f32.mrb[68].mxu1 }
 0x71b   : > { %v2266_v51 = vadd.f32 %v3148_v49, %v4184_v27  ;;  %v2257_v50 = vpop.f32.mrb[69].mxu1 }
 0x71c   : > { %v2258_v10 = vadd.f32 %v4184_v27, %v2257_v50  ;;  %v3149_v52 = vpop.f32.mrb[70].mxu1  ;;  %2511 = vmatmul.mubr.bf16.gmra.mrb[52].mxu0 %v2353_v46 }
 0x71d   : > { %v2326_v53 = vmul.f32 0.2, %v2266_v51  ;;  %v2269_v4 = vadd.f32 %v3149_v52, %v4184_v27  ;;  %v2260_v13 = vpop.f32.mrb[71].mxu1  ;;  %2520 = vmatprep.mubr.bf16.mxu0 %v3421_v8  ;;  %vm2310_vm11 = vcmp.gt.f32.partialorder %v2266_v51, 0.0 }
 0x71e   : > { %v2324_v0 = vmul.f32 0.2, %v2258_v10  ;;  %v2261_v55 = vadd.f32 %v4184_v27, %v2260_v13  ;;  %vm2308_vm12 = vcmp.gt.f32.partialorder %v2258_v10, 0.0 }
 0x71f   : > { %vm2311_vm13 = vcmp.gt.f32.partialorder %v2269_v4, 0.0  ;;  %v2327_v56 = vmul.f32 0.2, %v2269_v4  ;;  %v2342_v43 = vsel %vm2310_vm11, %v2266_v51, %v2326_v53 }
 0x720   : > { %vm2309_vm14 = vcmp.gt.f32.partialorder %v2261_v55, 0.0  ;;  %v2325_v57 = vmul.f32 0.2, %v2261_v55  ;;  %v2340_v60 = vsel %vm2308_vm12, %v2258_v10, %v2324_v0 }
 0x721   : > { %v2343_v58 = vsel %vm2311_vm13, %v2269_v4, %v2327_v56 }
 0x722   : > { %v3152_v59 = vpop.f32.mrb[72].mxu1  ;;  %v2341_v61 = vsel %vm2309_vm14, %v2261_v55, %v2325_v57  ;;  %v2355_v62 = vpack.c.bf16 %v2343_v58, %v2342_v43 }
 0x723   : > { %v2282_v6 = vadd.f32 %v3152_v59, %v4184_v27  ;;  %v2273_v19 = vpop.f32.mrb[73].mxu1  ;;  %v2354_v63 = vpack.c.bf16 %v2341_v61, %v2340_v60 }
 0x724   : > { %v2274_v16 = vadd.f32 %v4184_v27, %v2273_v19  ;;  %v3153_v1 = vpop.f32.mrb[74].mxu1 }
 0x725   : > { %v2330_v2 = vmul.f32 0.2, %v2282_v6  ;;  %v2285_v22 = vadd.f32 %v3153_v1, %v4184_v27  ;;  %v2276_v14 = vpop.f32.mrb[75].mxu1  ;;  %2521 = vmatmul.mubr.bf16.gmra.mrb[56].mxu0 %v2354_v63  ;;  %vm2314_vm15 = vcmp.gt.f32.partialorder %v2282_v6, 0.0 }
 0x726   : > { %v2328_v3 = vmul.f32 0.2, %v2274_v16  ;;  %v2277_v5 = vadd.f32 %v4184_v27, %v2276_v14  ;;  %2530 = vmatprep.mubr.bf16.mxu0 %v3421_v8  ;;  %vm2312_vm0 = vcmp.gt.f32.partialorder %v2274_v16, 0.0 }
 0x727   : > { %vm2315_vm1 = vcmp.gt.f32.partialorder %v2285_v22, 0.0  ;;  %v2331_v7 = vmul.f32 0.2, %v2285_v22  ;;  %v2346_v11 = vsel %vm2314_vm15, %v2282_v6, %v2330_v2 }
 0x728   : > { %vm2313_vm2 = vcmp.gt.f32.partialorder %v2277_v5, 0.0  ;;  %v2329_v9 = vmul.f32 0.2, %v2277_v5  ;;  %v2344_v18 = vsel %vm2312_vm0, %v2274_v16, %v2328_v3 }
 0x729   : > { %v2347_v15 = vsel %vm2315_vm1, %v2285_v22, %v2331_v7 }
 0x72a   : > { %v3156_v17 = vpop.f32.mrb[76].mxu1  ;;  %v2345_v20 = vsel %vm2313_vm2, %v2277_v5, %v2329_v9  ;;  %v2357_v21 = vpack.c.bf16 %v2347_v15, %v2346_v11 }
 0x72b   : > { %v2298_v34 = vadd.f32 %v3156_v17, %v4184_v27  ;;  %v2289_v12 = vpop.f32.mrb[77].mxu1  ;;  %v2356_v40 = vpack.c.bf16 %v2345_v20, %v2344_v18 }
 0x72c   : > { %v2290_v23 = vadd.f32 %v4184_v27, %v2289_v12  ;;  %v3157_v33 = vpop.f32.mrb[78].mxu1 }
 0x72d   : > { %v2334_v24 = vmul.f32 0.2, %v2298_v34  ;;  %v2301_v25 = vadd.f32 %v3157_v33, %v4184_v27  ;;  %v2292_v26 = vpop.f32.mrb[79].mxu1  ;;  %2531 = vmatmul.mubr.bf16.gmra.mrb[60].mxu0 %v2355_v62  ;;  %vm2318_vm3 = vcmp.gt.f32.partialorder %v2298_v34, 0.0 }
 0x72e   : > { %v2332_v30 = vmul.f32 0.2, %v2290_v23  ;;  %v2293_v36 = vadd.f32 %v4184_v27, %v2292_v26  ;;  %2540 = vmatprep.mubr.bf16.mxu0 %v3421_v8  ;;  %vm2316_vm5 = vcmp.gt.f32.partialorder %v2290_v23, 0.0  ;;  %v2378_v27 = vlaneseq }
 0x72f   : > { %vm2319_vm7 = vcmp.gt.f32.partialorder %v2301_v25, 0.0  ;;  %v2335_v28 = vmul.f32 0.2, %v2301_v25  ;;  %v2350_v31 = vsel %vm2318_vm3, %v2298_v34, %v2334_v24 }
 0x730   : > { %vm2317_vm6 = vcmp.gt.f32.partialorder %v2293_v36, 0.0  ;;  %v2333_v29 = vmul.f32 0.2, %v2293_v36  ;;  %v2348_v35 = vsel %vm2316_vm5, %v2290_v23, %v2332_v30  ;;  %v2379_v39 = vshrl.u32 %v2378_v27, 7 }
 0x731   : > { %v2351_v32 = vsel %vm2319_vm7, %v2301_v25, %v2335_v28 }
 0x732   : > { %v2349_v37 = vsel %vm2317_vm6, %v2293_v36, %v2333_v29  ;;  %v2359_v38 = vpack.c.bf16 %v2351_v32, %v2350_v31  ;;  %v2380_v47 = vsub.s32 0, %v2379_v39  ;;  %v2384_v42 = vsub.s32 1, %v2379_v39 }
 0x733   : > { %v2358_v54 = vpack.c.bf16 %v2349_v37, %v2348_v35 }
 0x734   : > { %v4212_v44 = vrot.slane %v2376_v41, %v2380_v47  ;;  %v4214_v45 = vrot.slane %v2376_v41, %v2384_v42 }
 0x735   : > { %2541 = vmatmul.mubr.bf16.gmra.mrb[64].mxu0 %v2356_v40 }
 0x736   : > { %2550 = vmatprep.mubr.bf16.mxu0 %v3421_v8 }
 0x73d   : > { %2551 = vmatmul.mubr.bf16.gmra.mrb[68].mxu0 %v2357_v21 }
 0x73e   : > { %2560 = vmatprep.mubr.bf16.mxu0 %v3421_v8 }
 0x745   : > { %2561 = vmatmul.mubr.bf16.gmra.mrb[72].mxu0 %v2358_v54 }
 0x746   : > { %2570 = vmatprep.mubr.bf16.mxu0 %v3421_v8 }
 0x74d   : > { %2571 = vmatmul.mubr.bf16.gmra.mrb[76].mxu0 %v2359_v38 }
 0x7e7   : > { %v2502_v46 = vpop.f32.mrb[48].mxu0 }
 0x7e8   : > { %v2503_v48 = vadd.f32 %v2502_v46, %v4212_v44  ;;  %v2504_v49 = vpop.f32.mrb[49].mxu0 }
 0x7e9   : > { %v2505_v51 = vadd.f32 %v2504_v49, %v4214_v45  ;;  %v2506_v8 = vpop.f32.mrb[50].mxu0 }
 0x7ea   : > { %2581 = vst [vmem:[%s4220_s3] sm:$0xff] %v2503_v48  ;;  %v2507_v50 = vadd.f32 %v2506_v8, %v4212_v44  ;;  %v2508_v10 = vpop.f32.mrb[51].mxu0 }
 0x7eb   : > { %2582 = vst [vmem:[%s4220_s3 + $0x8] sm:$0xff] %v2505_v51  ;;  %v2509_v52 = vadd.f32 %v2508_v10, %v4214_v45 }
 0x7ec   : > { %2583 = vst [vmem:[%s4220_s3 + $0x10] sm:$0xff] %v2507_v50 }
 0x7ed   : > { %2584 = vst [vmem:[%s4220_s3 + $0x18] sm:$0xff] %v2509_v52 }
 0x7ef   : > { %v2512_v53 = vpop.f32.mrb[52].mxu0 }
 0x7f0   : > { %v2513_v4 = vadd.f32 %v2512_v53, %v4212_v44  ;;  %v2514_v13 = vpop.f32.mrb[53].mxu0 }
 0x7f1   : > { %v2515_v0 = vadd.f32 %v2514_v13, %v4214_v45  ;;  %v2516_v55 = vpop.f32.mrb[54].mxu0 }
 0x7f2   : > { %2585 = vst [vmem:[%s4220_s3 + $0x20] sm:$0xff] %v2513_v4  ;;  %v2517_v56 = vadd.f32 %v2516_v55, %v4212_v44  ;;  %v2518_v57 = vpop.f32.mrb[55].mxu0 }
 0x7f3   : > { %2586 = vst [vmem:[%s4220_s3 + $0x28] sm:$0xff] %v2515_v0  ;;  %v2519_v43 = vadd.f32 %v2518_v57, %v4214_v45 }
 0x7f4   : > { %2587 = vst [vmem:[%s4220_s3 + $0x30] sm:$0xff] %v2517_v56 }
 0x7f5   : > { %2588 = vst [vmem:[%s4220_s3 + $0x38] sm:$0xff] %v2519_v43 }
 0x7f8   : > { %v2522_v58 = vpop.f32.mrb[56].mxu0 }
 0x7f9   : > { %v2523_v59 = vadd.f32 %v2522_v58, %v4212_v44  ;;  %v2524_v60 = vpop.f32.mrb[57].mxu0 }
 0x7fa   : > { %v2525_v61 = vadd.f32 %v2524_v60, %v4214_v45  ;;  %v2526_v62 = vpop.f32.mrb[58].mxu0 }
 0x7fb   : > { %2589 = vst [vmem:[%s4220_s3 + $0x40] sm:$0xff] %v2523_v59  ;;  %v2527_v6 = vadd.f32 %v2526_v62, %v4212_v44  ;;  %v2528_v19 = vpop.f32.mrb[59].mxu0 }
 0x7fc   : > { %2590 = vst [vmem:[%s4220_s3 + $0x48] sm:$0xff] %v2525_v61  ;;  %v2529_v63 = vadd.f32 %v2528_v19, %v4214_v45 }
 0x7fd   : > { %2591 = vst [vmem:[%s4220_s3 + $0x50] sm:$0xff] %v2527_v6 }
 0x7fe   : > { %2592 = vst [vmem:[%s4220_s3 + $0x58] sm:$0xff] %v2529_v63 }
 0x800   : > { %v2532_v16 = vpop.f32.mrb[60].mxu0 }
 0x801   : > { %v2533_v1 = vadd.f32 %v2532_v16, %v4212_v44  ;;  %v2534_v2 = vpop.f32.mrb[61].mxu0 }
 0x802   : > { %v2535_v22 = vadd.f32 %v2534_v2, %v4214_v45  ;;  %v2536_v14 = vpop.f32.mrb[62].mxu0 }
 0x803   : > { %2593 = vst [vmem:[%s4220_s3 + $0x60] sm:$0xff] %v2533_v1  ;;  %v2537_v3 = vadd.f32 %v2536_v14, %v4212_v44  ;;  %v2538_v5 = vpop.f32.mrb[63].mxu0 }
 0x804   : > { %2594 = vst [vmem:[%s4220_s3 + $0x68] sm:$0xff] %v2535_v22  ;;  %v2539_v7 = vadd.f32 %v2538_v5, %v4214_v45 }
 0x805   : > { %2595 = vst [vmem:[%s4220_s3 + $0x70] sm:$0xff] %v2537_v3 }
 0x806   : > { %2596 = vst [vmem:[%s4220_s3 + $0x78] sm:$0xff] %v2539_v7 }
 0x808   : > { %v2542_v9 = vpop.f32.mrb[64].mxu0 }
 0x809   : > { %v2543_v11 = vadd.f32 %v2542_v9, %v4212_v44  ;;  %v2544_v15 = vpop.f32.mrb[65].mxu0 }
 0x80a   : > { %v2545_v17 = vadd.f32 %v2544_v15, %v4214_v45  ;;  %v2546_v18 = vpop.f32.mrb[66].mxu0 }
 0x80b   : > { %2597 = vst [vmem:[%s4220_s3 + $0x80] sm:$0xff] %v2543_v11  ;;  %v2547_v20 = vadd.f32 %v2546_v18, %v4212_v44  ;;  %v2548_v21 = vpop.f32.mrb[67].mxu0 }
 0x80c   : > { %2598 = vst [vmem:[%s4220_s3 + $0x88] sm:$0xff] %v2545_v17  ;;  %v2549_v34 = vadd.f32 %v2548_v21, %v4214_v45 }
 0x80d   : > { %2599 = vst [vmem:[%s4220_s3 + $0x90] sm:$0xff] %v2547_v20 }
 0x80e   : > { %2600 = vst [vmem:[%s4220_s3 + $0x98] sm:$0xff] %v2549_v34 }
 0x810   : > { %v2552_v12 = vpop.f32.mrb[68].mxu0 }
 0x811   : > { %v2553_v40 = vadd.f32 %v2552_v12, %v4212_v44  ;;  %v2554_v23 = vpop.f32.mrb[69].mxu0 }
 0x812   : > { %v2555_v33 = vadd.f32 %v2554_v23, %v4214_v45  ;;  %v2556_v24 = vpop.f32.mrb[70].mxu0 }
 0x813   : > { %2601 = vst [vmem:[%s4220_s3 + $0xa0] sm:$0xff] %v2553_v40  ;;  %v2557_v25 = vadd.f32 %v2556_v24, %v4212_v44  ;;  %v2558_v26 = vpop.f32.mrb[71].mxu0 }
 0x814   : > { %2602 = vst [vmem:[%s4220_s3 + $0xa8] sm:$0xff] %v2555_v33  ;;  %v2559_v30 = vadd.f32 %v2558_v26, %v4214_v45 }
 0x815   : > { %2603 = vst [vmem:[%s4220_s3 + $0xb0] sm:$0xff] %v2557_v25 }
 0x816   : > { %2604 = vst [vmem:[%s4220_s3 + $0xb8] sm:$0xff] %v2559_v30 }
 0x818   : > { %v2562_v36 = vpop.f32.mrb[72].mxu0 }
 0x819   : > { %v2563_v28 = vadd.f32 %v2562_v36, %v4212_v44  ;;  %v2564_v29 = vpop.f32.mrb[73].mxu0 }
 0x81a   : > { %v2565_v31 = vadd.f32 %v2564_v29, %v4214_v45  ;;  %v2566_v32 = vpop.f32.mrb[74].mxu0 }
 0x81b   : > { %2605 = vst [vmem:[%s4220_s3 + $0xc0] sm:$0xff] %v2563_v28  ;;  %v2567_v35 = vadd.f32 %v2566_v32, %v4212_v44  ;;  %v2568_v37 = vpop.f32.mrb[75].mxu0 }
 0x81c   : > { %2606 = vst [vmem:[%s4220_s3 + $0xc8] sm:$0xff] %v2565_v31  ;;  %v2569_v38 = vadd.f32 %v2568_v37, %v4214_v45 }
 0x81d   : > { %2607 = vst [vmem:[%s4220_s3 + $0xd0] sm:$0xff] %v2567_v35 }
 0x81e   : > { %2608 = vst [vmem:[%s4220_s3 + $0xd8] sm:$0xff] %v2569_v38 }
 0x820   : > { %v2572_v54 = vpop.f32.mrb[76].mxu0 }
 0x821   : > { %v2573_v27 = vadd.f32 %v2572_v54, %v4212_v44  ;;  %v2574_v39 = vpop.f32.mrb[77].mxu0 }
 0x822   : > { %v2575_v47 = vadd.f32 %v2574_v39, %v4214_v45  ;;  %v2576_v41 = vpop.f32.mrb[78].mxu0 }
 0x823   : > { %2609 = vst [vmem:[%s4220_s3 + $0xe0] sm:$0xff] %v2573_v27  ;;  %v2577_v42 = vadd.f32 %v2576_v41, %v4212_v44  ;;  %v2578_v46 = vpop.f32.mrb[79].mxu0 }
 0x824   : > { %2610 = vst [vmem:[%s4220_s3 + $0xe8] sm:$0xff] %v2575_v47  ;;  %v2579_v48 = vadd.f32 %v2578_v46, %v4214_v45 }
 0x825   : > { %2611 = vst [vmem:[%s4220_s3 + $0xf0] sm:$0xff] %v2577_v42 }
 0x826   : > { %2612 = vst [vmem:[%s4220_s3 + $0xf8] sm:$0xff] %v2579_v48 }
 0x827   : > { %3362 = shalt.err (!%p3359_p4)
}
 0x828   : > { %s3363_s3 = scalar_lea.hbm %s4285_s20, 4096  ;;  %s3367_s0 = scalar_lea.hbm %s4398_s16, 8192 }
 0x829   : > { %p3364_p5 = scmp.ne.s32.totalorder %s4285_s20, %s3363_s3  ;;  %p3368_p1 = scmp.lt.u32.totalorder %s4285_s20, %s4398_s16 }
 0x82a   : > { %p3369_p3 = scmp.lt.u32.totalorder %s3367_s0, %s3363_s3  ;;  %p3371_p11 = scmp.lt.u32.totalorder %s3363_s3, %s4285_s20 }
 0x82b   : > { %p3365_p7 = pnand %p3364_p5, %p4399_p12 }
 0x82c   : > { %p3370_p6 = por %p3369_p3, %p3368_p1 }
 0x82d   : > { %p3366_p9 = pneg %p3365_p7 }
 0x82e   : > { %p3372_p13 = por %p3371_p11, %p3370_p6 }
 0x830   : > { %p3373_p8 = pnand %p3372_p13, %p3366_p9 }
 0x832   : > { %3376 = shalt.err (!%p3373_p8)
}
 0x833   : > { %s3423_s22 = smov 256   ;;  %s3424_s26 = smov 16  }
 0x834   : > { %s4400_s4 = scalar_lea.sflag [#allocation4], %s3629_s23 }
 0x835   : > { %3176 = dma.vmem_to_hbm [thread:$0]  (%p4399_p12), %s4287_s29, 4096, %s4285_s20, %s4400_s4, %s3423_s22, %s3423_s22, %s3424_s26  }
 0x836 PF: > { %s4401_s25 = sld [smem:[#allocation8_spill]]  ;;  %p4402_p10 = scmp.ne.s32.totalorder %s4384_s28, 0 }
 0x837   : > { %p4403_p0 = scmp.ge.s32.totalorder %s3415_s21, 2 }
 0x839   : > { %p3183_p2 = pnand %p4403_p0, %p4402_p10 }
 0x83c   : > { %s2668_s1 = sand.u32 1, %s4401_s25  }
 0x83d   : > { %s2669_s3 = scalar_lea.sflag [#allocation4], %s2668_s1 }
 0x83e   : > { %3398 = dma.done.wait (!%p3183_p2), %s2669_s3, 4096  }
 0x83f   : > { %3400 = vsyncadd (!%p3183_p2), %s2669_s3, 4294963200  ;;  %s4404_s21 = sld [smem:[#allocation10_spill]]  ;;  %s4405_s2 = sld [smem:[#allocation9_spill]] }
 0x840   : > { %s4406_s20 = sld [smem:[#allocation11_spill]]  ;;  %s4407_s0 = smov %s3407_s30 }
 0x845   : > { %p33_p4 = scmp.ge.s32.totalorder %s4404_s21, 4   ;;  %s4408_s30 = smov %s4405_s2 }
 0x847   :  { %35 = sbr.rel (!%p33_p4) target bundleno = 14 (0xe), region = 152 }
 0x84e   :  { %2682 = vsyncpa [#allocation3], 1 }
 0x84f   :  { %2684 = vsyncpa [#allocation3 + $0x1], 1 }
 0x850   :  { %2685 = vsyncpa [#allocation4], 1 }
 0x851   :  { %2687 = vsyncpa [#allocation4 + $0x1], 1 }

</bundles_post_ra>
